<compile_context>
chip_gen: v6e
topology: v6e:2x2x1
jax: 0.10.0
libtpu: 0.0.40
codegen_flags: <defaults>
</compile_context>

<pallas_src>
import numpy as np
import jax
import jax.numpy as jnp
from jax.experimental import pallas as pl
from jax.experimental.pallas import tpu as pltpu


# ----------------------------- fused kernel --------------------------------

def _fused_net_kernel(x_ref, mask_ref, m1_ref, b1_ref, w2_ref, b2_ref,
                      sel_ref, wfc1_ref, bfc1_ref, wfc2_ref, bfc2_ref,
                      out_ref, hm_ref):
    f32 = jnp.float32
    B16 = x_ref.shape[0]           # Bt * 16 (each sample owns a 16-row block)
    Bt = out_ref.shape[0]
    R1 = B16 - 2                   # conv1 rows computed (rows = b*16 + oh)

    # ---- conv1 (1->16, 3x3, pad 1) + ReLU: 3 MXU matmuls against banded weights.
    # rows = (b, oh) ; lanes = 16*ow + co  (224 dense lanes)
    acc1 = jnp.dot(x_ref[0:R1, :], m1_ref[0], preferred_element_type=f32)
    acc1 = acc1 + jnp.dot(x_ref[1:R1 + 1, :], m1_ref[1], preferred_element_type=f32)
    acc1 = acc1 + jnp.dot(x_ref[2:R1 + 2, :], m1_ref[2], preferred_element_type=f32)
    c1 = jnp.maximum(acc1 + b1_ref[...], 0.0) * mask_ref[0:R1, :]   # zero junk rows (oh>=14)

    # ---- maxpool 2x2 stride 2: vertical max via row-shifted slices,
    #      horizontal max via lane-shifted slices (pooled value at row b*16+2*ph,
    #      lane 32*pw + co; other rows/lanes are junk and get zero weight later).
    vmax = jnp.maximum(c1[0:R1 - 1, :], c1[1:R1, :])
    hmax = jnp.maximum(vmax[:, 0:208], vmax[:, 16:224])             # (R1-1, 208)

    # ---- stage pooled rows in scratch; rows {b*16} double as conv2's vertical
    #      zero padding (ih = -1 / ih = 7), so only borders/tail are zeroed.
    hm_ref[0:2, :] = jnp.zeros((2, 208), f32)
    hm_ref[2:B16 - 1, :] = hmax
    hm_ref[B16 - 1:, :] = jnp.zeros((9, 208), f32)

    # ---- conv2 (16->36, 3x3, pad 1) + ReLU: 3 MXU matmuls; the banded weights
    #      fold in the width padding and ignore the junk pooled lanes.
    #      valid output rows are r = b*16 + 2*oh2 ; lanes = 36*ow2 + co2 (252).
    acc2 = jnp.dot(hm_ref[0:B16, :], w2_ref[0], preferred_element_type=f32)
    acc2 = acc2 + jnp.dot(hm_ref[2:B16 + 2, :], w2_ref[1], preferred_element_type=f32)
    acc2 = acc2 + jnp.dot(hm_ref[4:B16 + 4, :], w2_ref[2], preferred_element_type=f32)
    out2 = jnp.maximum(acc2 + b2_ref[...], 0.0)                     # (B16, 252)

    # ---- fc1 (1764->100) + ReLU with NO flatten stores:
    #      sel[oh2] (Bt, B16) picks rows b*16 + 2*oh2; wfc1[oh2] (252,128) is the
    #      matching, permuted slice of fc1's weight (N padded 100 -> 128).
    acc = jnp.zeros((Bt, 128), f32) + bfc1_ref[...]
    for oh2 in range(7):
        rows = jnp.dot(sel_ref[oh2], out2, preferred_element_type=f32)        # (Bt, 252)
        acc = acc + jnp.dot(rows, wfc1_ref[oh2], preferred_element_type=f32)  # (Bt, 128)
    h1 = jnp.maximum(acc, 0.0)

    # ---- fc2 (100->5), lane-dense (Bt,128) output slab (sliced to 5 outside).
    out_ref[...] = jnp.dot(h1, wfc2_ref[...], preferred_element_type=f32) + bfc2_ref[...]


# ----------------------------- parameters ----------------------------------

def init_params(key):
    """Deterministic init mimicking PyTorch's default U(-1/sqrt(fan_in), +)."""
    ks = jax.random.split(key, 8)

    def unif(k, shape, fan_in):
        bound = 1.0 / jnp.sqrt(jnp.float32(fan_in))
        return jax.random.uniform(k, shape, jnp.float32, -bound, bound)

    return {
        "conv1_w": unif(ks[0], (16, 1, 3, 3), 1 * 3 * 3),
        "conv1_b": unif(ks[1], (16,), 1 * 3 * 3),
        "conv2_w": unif(ks[2], (36, 16, 3, 3), 16 * 3 * 3),
        "conv2_b": unif(ks[3], (36,), 16 * 3 * 3),
        "fc1_w": unif(ks[4], (100, 36 * 7 * 7), 36 * 7 * 7),  # PyTorch (out, in)
        "fc1_b": unif(ks[5], (100,), 36 * 7 * 7),
        "fc2_w": unif(ks[6], (5, 100), 100),
        "fc2_b": unif(ks[7], (5,), 100),
    }


def prepare_params(p, batch_tile):
    """One-time re-layout of PyTorch-style weights into kernel-ready arrays."""
    bt = int(batch_tile)
    w1 = np.asarray(p["conv1_w"], np.float32)     # (16, 1, 3, 3)
    b1 = np.asarray(p["conv1_b"], np.float32)
    w2 = np.asarray(p["conv2_w"], np.float32)     # (36, 16, 3, 3)
    b2 = np.asarray(p["conv2_b"], np.float32)
    fw1 = np.asarray(p["fc1_w"], np.float32)      # (100, 1764)
    fb1 = np.asarray(p["fc1_b"], np.float32)
    fw2 = np.asarray(p["fc2_w"], np.float32)      # (5, 100)
    fb2 = np.asarray(p["fc2_b"], np.float32)

    # conv1 banded matrices: m1[di, ow+dj, 16*ow + co] = w1[co, 0, di, dj]
    m1 = np.zeros((3, 16, 224), np.float32)
    for di in range(3):
        for dj in range(3):
            for ow in range(14):
                m1[di, ow + dj, 16 * ow:16 * ow + 16] = w1[:, 0, di, dj]
    b1row = np.tile(b1, 14).reshape(1, 224)

    # conv2 banded matrices on the pooled layout (lanes 32*pw + ci -> 36*ow2 + co2):
    # w2m[di, 32*iw + ci, 36*ow2 + co2] = w2[co2, ci, di, dj], iw = ow2 + dj - 1
    w2m = np.zeros((3, 208, 252), np.float32)
    for di in range(3):
        for dj in range(3):
            for ow2 in range(7):
                iw = ow2 + dj - 1
                if 0 <= iw < 7:
                    w2m[di, 32 * iw:32 * iw + 16, 36 * ow2:36 * ow2 + 36] = w2[:, :, di, dj].T
    b2row = np.tile(b2, 7).reshape(1, 252)

    # fc1: torch flatten order of (B,36,7,7) is co2*49 + oh2*7 + ow2.
    # Our features: row-slice oh2, lane 36*ow2 + co2  -> wfc1[oh2, 36*ow2+co2, n]
    t = fw1.reshape(100, 36, 7, 7)                 # (n, co2, oh2, ow2)
    wfc1 = np.zeros((7, 252, 128), np.float32)
    for oh2 in range(7):
        blk = np.transpose(t[:, :, oh2, :], (2, 1, 0)).reshape(252, 100)  # (ow2*36+co2, n)
        wfc1[oh2, :, :100] = blk
    bfc1 = np.zeros((1, 128), np.float32)
    bfc1[0, :100] = fb1

    # fc2: (5,100) -> padded (128,128) transpose; padded logits sliced outside.
    wfc2 = np.zeros((128, 128), np.float32)
    wfc2[:100, :5] = fw2.T
    bfc2 = np.zeros((1, 128), np.float32)
    bfc2[0, :5] = fb2

    # fc1 row selectors: sel[oh2, b, b*16 + 2*oh2] = 1  (pick valid conv2 rows)
    sel = np.zeros((7, bt, bt * 16), np.float32)
    for oh2 in range(7):
        for b in range(bt):
            sel[oh2, b, b * 16 + 2 * oh2] = 1.0

    # rows with (r % 16) >= 14 inside a batch block are junk conv1 rows -> zeroed
    rmask = (np.arange(bt * 16) % 16 < 14).astype(np.float32).reshape(bt * 16, 1)

    out = dict(m1=m1, b1=b1row, w2=w2m, b2=b2row, sel=sel, rmask=rmask,
               wfc1=wfc1, bfc1=bfc1, wfc2=wfc2, bfc2=bfc2)
    return {k: jnp.asarray(v) for k, v in out.items()}


# ----------------------------- forward pass ---------------------------------

def net_forward(kp, x_nchw):
    """Replicates Net.forward for x of shape (B, 1, 14, 14); returns (B, 5)."""
    B = x_nchw.shape[0]
    Bt = kp["sel"].shape[1]
    assert B % Bt == 0, (B, Bt)
    grid = (B // Bt,)

    # NCHW (C=1) -> padded (B,16,16) -> (B*16, 16): rows=(b, padded h), lanes=padded w.
    x = x_nchw.astype(jnp.float32).reshape(B, 14, 14)
    xpad = jnp.pad(x, ((0, 0), (1, 1), (1, 1)))
    x2d = xpad.reshape(B * 16, 16)

    rep2 = lambda i: (0, 0)
    rep3 = lambda i: (0, 0, 0)

    out_pad = pl.pallas_call(
        _fused_net_kernel,
        out_shape=jax.ShapeDtypeStruct((B, 128), jnp.float32),
        grid=grid,
        in_specs=[
            pl.BlockSpec((Bt * 16, 16), lambda i: (i, 0)),       # input tile (batch grid)
            pl.BlockSpec((Bt * 16, 1), rep2),                    # conv1 row mask
            pl.BlockSpec((3, 16, 224), rep3),                    # conv1 banded weights
            pl.BlockSpec((1, 224), rep2),                        # conv1 bias row
            pl.BlockSpec((3, 208, 252), rep3),                   # conv2 banded weights
            pl.BlockSpec((1, 252), rep2),                        # conv2 bias row
            pl.BlockSpec((7, Bt, Bt * 16), rep3),                # fc1 row selectors
            pl.BlockSpec((7, 252, 128), rep3),                   # fc1 weights (permuted, padded)
            pl.BlockSpec((1, 128), rep2),                        # fc1 bias
            pl.BlockSpec((128, 128), rep2),                      # fc2 weights (padded)
            pl.BlockSpec((1, 128), rep2),                        # fc2 bias
        ],
        out_specs=pl.BlockSpec((Bt, 128), lambda i: (i, 0)),
        scratch_shapes=[pltpu.VMEM((Bt * 16 + 8, 208), jnp.float32)],  # pooled rows + zero borders
        compiler_params=pltpu.CompilerParams(
            dimension_semantics=("parallel",),
            vmem_limit_bytes=32 * 1024 * 1024),
    )(x2d, kp["rmask"], kp["m1"], kp["b1"], kp["w2"], kp["b2"],
      kp["sel"], kp["wfc1"], kp["bfc1"], kp["wfc2"], kp["bfc2"])

    return out_pad[:, :5]


# ----------------------------- pure-JAX reference ---------------------------

def net_reference(p, x):
    out = jax.lax.conv_general_dilated(
        x, p["conv1_w"], (1, 1), "SAME", dimension_numbers=("NCHW", "OIHW", "NCHW"))
    out = jax.nn.relu(out + p["conv1_b"][None, :, None, None])
    out = jax.lax.reduce_window(out, -jnp.inf, jax.lax.max,
                                (1, 1, 2, 2), (1, 1, 2, 2), "VALID")
    out = jax.lax.conv_general_dilated(
        out, p["conv2_w"], (1, 1), "SAME", dimension_numbers=("NCHW", "OIHW", "NCHW"))
    out = jax.nn.relu(out + p["conv2_b"][None, :, None, None])
    out = out.reshape(out.shape[0], -1)
    out = jax.nn.relu(out @ p["fc1_w"].T + p["fc1_b"])
    return out @ p["fc2_w"].T + p["fc2_b"]


# ----------------------------- main ------------------------------------------

if __name__ == "__main__":
    key = jax.random.PRNGKey(0)
    k_params, k_x = jax.random.split(key)

    params = init_params(k_params)
    B = 2
    batch_tile = 8 if B % 8 == 0 else B            # 8-sample tiles when possible
    kparams = prepare_params(params, batch_tile)

    # Input implied by fc1 = Linear(36*7*7, ...): (B, 1, 14, 14) NCHW images.
    x = jax.random.normal(k_x, (B, 1, 14, 14), dtype=jnp.float32)

    fwd = jax.jit(net_forward)
    out = jax.block_until_ready(fwd(kparams, x))
    assert out.shape == (B, 5), out.shape

    ref = jax.block_until_ready(jax.jit(net_reference)(params, x))
    max_err = float(jnp.max(jnp.abs(out - ref)))
    assert max_err < 2e-2, f"mismatch vs pure-JAX reference: {max_err}"

    print("KERNEL_OK")
</pallas_src>

<mosaic_0001>
module attributes {stable_mosaic.version = 11 : i64} {
  func.func @_fused_net_kernel(%arg0: i32, %arg1: memref<32x16xf32, #tpu.memory_space<vmem>>, %arg2: memref<32x1xf32, #tpu.memory_space<vmem>>, %arg3: memref<3x16x224xf32, #tpu.memory_space<vmem>>, %arg4: memref<1x224xf32, #tpu.memory_space<vmem>>, %arg5: memref<3x208x252xf32, #tpu.memory_space<vmem>>, %arg6: memref<1x252xf32, #tpu.memory_space<vmem>>, %arg7: memref<7x2x32xf32, #tpu.memory_space<vmem>>, %arg8: memref<7x252x128xf32, #tpu.memory_space<vmem>>, %arg9: memref<1x128xf32, #tpu.memory_space<vmem>>, %arg10: memref<128x128xf32, #tpu.memory_space<vmem>>, %arg11: memref<1x128xf32, #tpu.memory_space<vmem>>, %arg12: memref<2x128xf32, #tpu.memory_space<vmem>>, %arg13: memref<40x208xf32, #tpu.memory_space<vmem>>) attributes {dimension_semantics = [#tpu.dimension_semantics<parallel>], iteration_bounds = array<i64: 1>, scalar_prefetch = 0 : i64, scratch_operands = 1 : i64, tpu.core_type = #tpu.core_type<tc>, window_params = [{transform_indices = @transform_0, window_bounds = array<i64: 32, 16>}, {pipeline_mode = #tpu.pipeline_mode<synchronous>, transform_indices = @transform_1, window_bounds = array<i64: 32, 1>}, {pipeline_mode = #tpu.pipeline_mode<synchronous>, transform_indices = @transform_2, window_bounds = array<i64: 3, 16, 224>}, {pipeline_mode = #tpu.pipeline_mode<synchronous>, transform_indices = @transform_3, window_bounds = array<i64: 1, 224>}, {pipeline_mode = #tpu.pipeline_mode<synchronous>, transform_indices = @transform_4, window_bounds = array<i64: 3, 208, 252>}, {pipeline_mode = #tpu.pipeline_mode<synchronous>, transform_indices = @transform_5, window_bounds = array<i64: 1, 252>}, {pipeline_mode = #tpu.pipeline_mode<synchronous>, transform_indices = @transform_6, window_bounds = array<i64: 7, 2, 32>}, {pipeline_mode = #tpu.pipeline_mode<synchronous>, transform_indices = @transform_7, window_bounds = array<i64: 7, 252, 128>}, {pipeline_mode = #tpu.pipeline_mode<synchronous>, transform_indices = @transform_8, window_bounds = array<i64: 1, 128>}, {pipeline_mode = #tpu.pipeline_mode<synchronous>, transform_indices = @transform_9, window_bounds = array<i64: 128, 128>}, {pipeline_mode = #tpu.pipeline_mode<synchronous>, transform_indices = @transform_10, window_bounds = array<i64: 1, 128>}, {transform_indices = @transform_11, window_bounds = array<i64: 2, 128>}]} {
    %c0 = arith.constant 0 : index
    %c0_0 = arith.constant 0 : index
    %0 = vector.load %arg1[%c0, %c0_0] : memref<32x16xf32, #tpu.memory_space<vmem>>, vector<30x16xf32>
    %c0_1 = arith.constant 0 : index
    %c0_2 = arith.constant 0 : index
    %c0_3 = arith.constant 0 : index
    %1 = vector.load %arg3[%c0_1, %c0_2, %c0_3] : memref<3x16x224xf32, #tpu.memory_space<vmem>>, vector<1x16x224xf32>
    %2 = vector.shape_cast %1 : vector<1x16x224xf32> to vector<16x224xf32>
    %cst = arith.constant dense<0.000000e+00> : vector<30x224xf32>
    %3 = tpu.matmul %0, %2, %cst {dimension_numbers = #tpu.dot_dimension_numbers<[1], [0], [0], [1], [0, 0, 1, 1], [], []>} : vector<30x16xf32>, vector<16x224xf32>, vector<30x224xf32> -> vector<30x224xf32>
    %c1 = arith.constant 1 : index
    %c0_4 = arith.constant 0 : index
    %4 = vector.load %arg1[%c1, %c0_4] : memref<32x16xf32, #tpu.memory_space<vmem>>, vector<30x16xf32>
    %c1_5 = arith.constant 1 : index
    %c0_6 = arith.constant 0 : index
    %c0_7 = arith.constant 0 : index
    %5 = vector.load %arg3[%c1_5, %c0_6, %c0_7] : memref<3x16x224xf32, #tpu.memory_space<vmem>>, vector<1x16x224xf32>
    %6 = vector.shape_cast %5 : vector<1x16x224xf32> to vector<16x224xf32>
    %cst_8 = arith.constant dense<0.000000e+00> : vector<30x224xf32>
    %7 = tpu.matmul %4, %6, %cst_8 {dimension_numbers = #tpu.dot_dimension_numbers<[1], [0], [0], [1], [0, 0, 1, 1], [], []>} : vector<30x16xf32>, vector<16x224xf32>, vector<30x224xf32> -> vector<30x224xf32>
    %8 = arith.addf %3, %7 : vector<30x224xf32>
    %c2 = arith.constant 2 : index
    %c0_9 = arith.constant 0 : index
    %9 = vector.load %arg1[%c2, %c0_9] : memref<32x16xf32, #tpu.memory_space<vmem>>, vector<30x16xf32>
    %c2_10 = arith.constant 2 : index
    %c0_11 = arith.constant 0 : index
    %c0_12 = arith.constant 0 : index
    %10 = vector.load %arg3[%c2_10, %c0_11, %c0_12] : memref<3x16x224xf32, #tpu.memory_space<vmem>>, vector<1x16x224xf32>
    %11 = vector.shape_cast %10 : vector<1x16x224xf32> to vector<16x224xf32>
    %cst_13 = arith.constant dense<0.000000e+00> : vector<30x224xf32>
    %12 = tpu.matmul %9, %11, %cst_13 {dimension_numbers = #tpu.dot_dimension_numbers<[1], [0], [0], [1], [0, 0, 1, 1], [], []>} : vector<30x16xf32>, vector<16x224xf32>, vector<30x224xf32> -> vector<30x224xf32>
    %13 = arith.addf %8, %12 : vector<30x224xf32>
    %c0_14 = arith.constant 0 : index
    %c0_15 = arith.constant 0 : index
    %14 = vector.load %arg4[%c0_14, %c0_15] : memref<1x224xf32, #tpu.memory_space<vmem>>, vector<1x224xf32>
    %15 = vector.broadcast %14 : vector<1x224xf32> to vector<30x224xf32>
    %16 = arith.addf %13, %15 : vector<30x224xf32>
    %cst_16 = arith.constant 0.000000e+00 : f32
    %17 = vector.broadcast %cst_16 : f32 to vector<30x224xf32>
    %18 = arith.maximumf %16, %17 : vector<30x224xf32>
    %c0_17 = arith.constant 0 : index
    %c0_18 = arith.constant 0 : index
    %19 = vector.load %arg2[%c0_17, %c0_18] : memref<32x1xf32, #tpu.memory_space<vmem>>, vector<30x1xf32>
    %20 = vector.broadcast %19 : vector<30x1xf32> to vector<30x224xf32>
    %21 = arith.mulf %18, %20 : vector<30x224xf32>
    %22 = vector.extract_strided_slice %21 {offsets = [0, 0], sizes = [29, 224], strides = [1, 1]} : vector<30x224xf32> to vector<29x224xf32>
    %23 = vector.extract_strided_slice %21 {offsets = [1, 0], sizes = [29, 224], strides = [1, 1]} : vector<30x224xf32> to vector<29x224xf32>
    %24 = arith.maximumf %22, %23 : vector<29x224xf32>
    %25 = vector.extract_strided_slice %24 {offsets = [0, 0], sizes = [29, 208], strides = [1, 1]} : vector<29x224xf32> to vector<29x208xf32>
    %26 = vector.extract_strided_slice %24 {offsets = [0, 16], sizes = [29, 208], strides = [1, 1]} : vector<29x224xf32> to vector<29x208xf32>
    %27 = arith.maximumf %25, %26 : vector<29x208xf32>
    %cst_19 = arith.constant 0.000000e+00 : f32
    %28 = vector.broadcast %cst_19 : f32 to vector<2x208xf32>
    %c0_20 = arith.constant 0 : index
    %c0_21 = arith.constant 0 : index
    %29 = vector.load %arg13[%c0_20, %c0_21] : memref<40x208xf32, #tpu.memory_space<vmem>>, vector<2x208xf32>
    tpu.vector_store %arg13[%c0_20, %c0_21], %28 {strides = array<i32>} : memref<40x208xf32, #tpu.memory_space<vmem>>, vector<2x208xf32>,
    %c2_22 = arith.constant 2 : index
    %c0_23 = arith.constant 0 : index
    %30 = vector.load %arg13[%c2_22, %c0_23] : memref<40x208xf32, #tpu.memory_space<vmem>>, vector<29x208xf32>
    tpu.vector_store %arg13[%c2_22, %c0_23], %27 {strides = array<i32>} : memref<40x208xf32, #tpu.memory_space<vmem>>, vector<29x208xf32>,
    %cst_24 = arith.constant 0.000000e+00 : f32
    %31 = vector.broadcast %cst_24 : f32 to vector<9x208xf32>
    %c31 = arith.constant 31 : index
    %c0_25 = arith.constant 0 : index
    %32 = vector.load %arg13[%c31, %c0_25] : memref<40x208xf32, #tpu.memory_space<vmem>>, vector<9x208xf32>
    tpu.vector_store %arg13[%c31, %c0_25], %31 {strides = array<i32>} : memref<40x208xf32, #tpu.memory_space<vmem>>, vector<9x208xf32>,
    %c0_26 = arith.constant 0 : index
    %c0_27 = arith.constant 0 : index
    %33 = vector.load %arg13[%c0_26, %c0_27] : memref<40x208xf32, #tpu.memory_space<vmem>>, vector<32x208xf32>
    %c0_28 = arith.constant 0 : index
    %c0_29 = arith.constant 0 : index
    %c0_30 = arith.constant 0 : index
    %34 = vector.load %arg5[%c0_28, %c0_29, %c0_30] : memref<3x208x252xf32, #tpu.memory_space<vmem>>, vector<1x208x252xf32>
    %35 = vector.shape_cast %34 : vector<1x208x252xf32> to vector<208x252xf32>
    %cst_31 = arith.constant dense<0.000000e+00> : vector<32x252xf32>
    %36 = tpu.matmul %33, %35, %cst_31 {dimension_numbers = #tpu.dot_dimension_numbers<[1], [0], [0], [1], [0, 0, 1, 1], [], []>} : vector<32x208xf32>, vector<208x252xf32>, vector<32x252xf32> -> vector<32x252xf32>
    %c2_32 = arith.constant 2 : index
    %c0_33 = arith.constant 0 : index
    %37 = vector.load %arg13[%c2_32, %c0_33] : memref<40x208xf32, #tpu.memory_space<vmem>>, vector<32x208xf32>
    %c1_34 = arith.constant 1 : index
    %c0_35 = arith.constant 0 : index
    %c0_36 = arith.constant 0 : index
    %38 = vector.load %arg5[%c1_34, %c0_35, %c0_36] : memref<3x208x252xf32, #tpu.memory_space<vmem>>, vector<1x208x252xf32>
    %39 = vector.shape_cast %38 : vector<1x208x252xf32> to vector<208x252xf32>
    %cst_37 = arith.constant dense<0.000000e+00> : vector<32x252xf32>
    %40 = tpu.matmul %37, %39, %cst_37 {dimension_numbers = #tpu.dot_dimension_numbers<[1], [0], [0], [1], [0, 0, 1, 1], [], []>} : vector<32x208xf32>, vector<208x252xf32>, vector<32x252xf32> -> vector<32x252xf32>
    %41 = arith.addf %36, %40 : vector<32x252xf32>
    %c4 = arith.constant 4 : index
    %c0_38 = arith.constant 0 : index
    %42 = vector.load %arg13[%c4, %c0_38] : memref<40x208xf32, #tpu.memory_space<vmem>>, vector<32x208xf32>
    %c2_39 = arith.constant 2 : index
    %c0_40 = arith.constant 0 : index
    %c0_41 = arith.constant 0 : index
    %43 = vector.load %arg5[%c2_39, %c0_40, %c0_41] : memref<3x208x252xf32, #tpu.memory_space<vmem>>, vector<1x208x252xf32>
    %44 = vector.shape_cast %43 : vector<1x208x252xf32> to vector<208x252xf32>
    %cst_42 = arith.constant dense<0.000000e+00> : vector<32x252xf32>
    %45 = tpu.matmul %42, %44, %cst_42 {dimension_numbers = #tpu.dot_dimension_numbers<[1], [0], [0], [1], [0, 0, 1, 1], [], []>} : vector<32x208xf32>, vector<208x252xf32>, vector<32x252xf32> -> vector<32x252xf32>
    %46 = arith.addf %41, %45 : vector<32x252xf32>
    %c0_43 = arith.constant 0 : index
    %c0_44 = arith.constant 0 : index
    %47 = vector.load %arg6[%c0_43, %c0_44] : memref<1x252xf32, #tpu.memory_space<vmem>>, vector<1x252xf32>
    %48 = vector.broadcast %47 : vector<1x252xf32> to vector<32x252xf32>
    %49 = arith.addf %46, %48 : vector<32x252xf32>
    %cst_45 = arith.constant 0.000000e+00 : f32
    %50 = vector.broadcast %cst_45 : f32 to vector<32x252xf32>
    %51 = arith.maximumf %49, %50 : vector<32x252xf32>
    %cst_46 = arith.constant 0.000000e+00 : f32
    %52 = vector.broadcast %cst_46 : f32 to vector<2x128xf32>
    %c0_47 = arith.constant 0 : index
    %c0_48 = arith.constant 0 : index
    %53 = vector.load %arg9[%c0_47, %c0_48] : memref<1x128xf32, #tpu.memory_space<vmem>>, vector<1x128xf32>
    %54 = vector.broadcast %53 : vector<1x128xf32> to vector<2x128xf32>
    %55 = arith.addf %52, %54 : vector<2x128xf32>
    %c0_49 = arith.constant 0 : index
    %c0_50 = arith.constant 0 : index
    %c0_51 = arith.constant 0 : index
    %56 = vector.load %arg7[%c0_49, %c0_50, %c0_51] : memref<7x2x32xf32, #tpu.memory_space<vmem>>, vector<1x2x32xf32>
    %57 = vector.shape_cast %56 : vector<1x2x32xf32> to vector<2x32xf32>
    %cst_52 = arith.constant dense<0.000000e+00> : vector<2x252xf32>
    %58 = tpu.matmul %57, %51, %cst_52 {dimension_numbers = #tpu.dot_dimension_numbers<[1], [0], [0], [1], [0, 0, 1, 1], [], []>} : vector<2x32xf32>, vector<32x252xf32>, vector<2x252xf32> -> vector<2x252xf32>
    %c0_53 = arith.constant 0 : index
    %c0_54 = arith.constant 0 : index
    %c0_55 = arith.constant 0 : index
    %59 = vector.load %arg8[%c0_53, %c0_54, %c0_55] : memref<7x252x128xf32, #tpu.memory_space<vmem>>, vector<1x252x128xf32>
    %60 = vector.shape_cast %59 : vector<1x252x128xf32> to vector<252x128xf32>
    %cst_56 = arith.constant dense<0.000000e+00> : vector<2x128xf32>
    %61 = tpu.matmul %58, %60, %cst_56 {dimension_numbers = #tpu.dot_dimension_numbers<[1], [0], [0], [1], [0, 0, 1, 1], [], []>} : vector<2x252xf32>, vector<252x128xf32>, vector<2x128xf32> -> vector<2x128xf32>
    %62 = arith.addf %55, %61 : vector<2x128xf32>
    %c1_57 = arith.constant 1 : index
    %c0_58 = arith.constant 0 : index
    %c0_59 = arith.constant 0 : index
    %63 = vector.load %arg7[%c1_57, %c0_58, %c0_59] : memref<7x2x32xf32, #tpu.memory_space<vmem>>, vector<1x2x32xf32>
    %64 = vector.shape_cast %63 : vector<1x2x32xf32> to vector<2x32xf32>
    %cst_60 = arith.constant dense<0.000000e+00> : vector<2x252xf32>
    %65 = tpu.matmul %64, %51, %cst_60 {dimension_numbers = #tpu.dot_dimension_numbers<[1], [0], [0], [1], [0, 0, 1, 1], [], []>} : vector<2x32xf32>, vector<32x252xf32>, vector<2x252xf32> -> vector<2x252xf32>
    %c1_61 = arith.constant 1 : index
    %c0_62 = arith.constant 0 : index
    %c0_63 = arith.constant 0 : index
    %66 = vector.load %arg8[%c1_61, %c0_62, %c0_63] : memref<7x252x128xf32, #tpu.memory_space<vmem>>, vector<1x252x128xf32>
    %67 = vector.shape_cast %66 : vector<1x252x128xf32> to vector<252x128xf32>
    %cst_64 = arith.constant dense<0.000000e+00> : vector<2x128xf32>
    %68 = tpu.matmul %65, %67, %cst_64 {dimension_numbers = #tpu.dot_dimension_numbers<[1], [0], [0], [1], [0, 0, 1, 1], [], []>} : vector<2x252xf32>, vector<252x128xf32>, vector<2x128xf32> -> vector<2x128xf32>
    %69 = arith.addf %62, %68 : vector<2x128xf32>
    %c2_65 = arith.constant 2 : index
    %c0_66 = arith.constant 0 : index
    %c0_67 = arith.constant 0 : index
    %70 = vector.load %arg7[%c2_65, %c0_66, %c0_67] : memref<7x2x32xf32, #tpu.memory_space<vmem>>, vector<1x2x32xf32>
    %71 = vector.shape_cast %70 : vector<1x2x32xf32> to vector<2x32xf32>
    %cst_68 = arith.constant dense<0.000000e+00> : vector<2x252xf32>
    %72 = tpu.matmul %71, %51, %cst_68 {dimension_numbers = #tpu.dot_dimension_numbers<[1], [0], [0], [1], [0, 0, 1, 1], [], []>} : vector<2x32xf32>, vector<32x252xf32>, vector<2x252xf32> -> vector<2x252xf32>
    %c2_69 = arith.constant 2 : index
    %c0_70 = arith.constant 0 : index
    %c0_71 = arith.constant 0 : index
    %73 = vector.load %arg8[%c2_69, %c0_70, %c0_71] : memref<7x252x128xf32, #tpu.memory_space<vmem>>, vector<1x252x128xf32>
    %74 = vector.shape_cast %73 : vector<1x252x128xf32> to vector<252x128xf32>
    %cst_72 = arith.constant dense<0.000000e+00> : vector<2x128xf32>
    %75 = tpu.matmul %72, %74, %cst_72 {dimension_numbers = #tpu.dot_dimension_numbers<[1], [0], [0], [1], [0, 0, 1, 1], [], []>} : vector<2x252xf32>, vector<252x128xf32>, vector<2x128xf32> -> vector<2x128xf32>
    %76 = arith.addf %69, %75 : vector<2x128xf32>
    %c3 = arith.constant 3 : index
    %c0_73 = arith.constant 0 : index
    %c0_74 = arith.constant 0 : index
    %77 = vector.load %arg7[%c3, %c0_73, %c0_74] : memref<7x2x32xf32, #tpu.memory_space<vmem>>, vector<1x2x32xf32>
    %78 = vector.shape_cast %77 : vector<1x2x32xf32> to vector<2x32xf32>
    %cst_75 = arith.constant dense<0.000000e+00> : vector<2x252xf32>
    %79 = tpu.matmul %78, %51, %cst_75 {dimension_numbers = #tpu.dot_dimension_numbers<[1], [0], [0], [1], [0, 0, 1, 1], [], []>} : vector<2x32xf32>, vector<32x252xf32>, vector<2x252xf32> -> vector<2x252xf32>
    %c3_76 = arith.constant 3 : index
    %c0_77 = arith.constant 0 : index
    %c0_78 = arith.constant 0 : index
    %80 = vector.load %arg8[%c3_76, %c0_77, %c0_78] : memref<7x252x128xf32, #tpu.memory_space<vmem>>, vector<1x252x128xf32>
    %81 = vector.shape_cast %80 : vector<1x252x128xf32> to vector<252x128xf32>
    %cst_79 = arith.constant dense<0.000000e+00> : vector<2x128xf32>
    %82 = tpu.matmul %79, %81, %cst_79 {dimension_numbers = #tpu.dot_dimension_numbers<[1], [0], [0], [1], [0, 0, 1, 1], [], []>} : vector<2x252xf32>, vector<252x128xf32>, vector<2x128xf32> -> vector<2x128xf32>
    %83 = arith.addf %76, %82 : vector<2x128xf32>
    %c4_80 = arith.constant 4 : index
    %c0_81 = arith.constant 0 : index
    %c0_82 = arith.constant 0 : index
    %84 = vector.load %arg7[%c4_80, %c0_81, %c0_82] : memref<7x2x32xf32, #tpu.memory_space<vmem>>, vector<1x2x32xf32>
    %85 = vector.shape_cast %84 : vector<1x2x32xf32> to vector<2x32xf32>
    %cst_83 = arith.constant dense<0.000000e+00> : vector<2x252xf32>
    %86 = tpu.matmul %85, %51, %cst_83 {dimension_numbers = #tpu.dot_dimension_numbers<[1], [0], [0], [1], [0, 0, 1, 1], [], []>} : vector<2x32xf32>, vector<32x252xf32>, vector<2x252xf32> -> vector<2x252xf32>
    %c4_84 = arith.constant 4 : index
    %c0_85 = arith.constant 0 : index
    %c0_86 = arith.constant 0 : index
    %87 = vector.load %arg8[%c4_84, %c0_85, %c0_86] : memref<7x252x128xf32, #tpu.memory_space<vmem>>, vector<1x252x128xf32>
    %88 = vector.shape_cast %87 : vector<1x252x128xf32> to vector<252x128xf32>
    %cst_87 = arith.constant dense<0.000000e+00> : vector<2x128xf32>
    %89 = tpu.matmul %86, %88, %cst_87 {dimension_numbers = #tpu.dot_dimension_numbers<[1], [0], [0], [1], [0, 0, 1, 1], [], []>} : vector<2x252xf32>, vector<252x128xf32>, vector<2x128xf32> -> vector<2x128xf32>
    %90 = arith.addf %83, %89 : vector<2x128xf32>
    %c5 = arith.constant 5 : index
    %c0_88 = arith.constant 0 : index
    %c0_89 = arith.constant 0 : index
    %91 = vector.load %arg7[%c5, %c0_88, %c0_89] : memref<7x2x32xf32, #tpu.memory_space<vmem>>, vector<1x2x32xf32>
    %92 = vector.shape_cast %91 : vector<1x2x32xf32> to vector<2x32xf32>
    %cst_90 = arith.constant dense<0.000000e+00> : vector<2x252xf32>
    %93 = tpu.matmul %92, %51, %cst_90 {dimension_numbers = #tpu.dot_dimension_numbers<[1], [0], [0], [1], [0, 0, 1, 1], [], []>} : vector<2x32xf32>, vector<32x252xf32>, vector<2x252xf32> -> vector<2x252xf32>
    %c5_91 = arith.constant 5 : index
    %c0_92 = arith.constant 0 : index
    %c0_93 = arith.constant 0 : index
    %94 = vector.load %arg8[%c5_91, %c0_92, %c0_93] : memref<7x252x128xf32, #tpu.memory_space<vmem>>, vector<1x252x128xf32>
    %95 = vector.shape_cast %94 : vector<1x252x128xf32> to vector<252x128xf32>
    %cst_94 = arith.constant dense<0.000000e+00> : vector<2x128xf32>
    %96 = tpu.matmul %93, %95, %cst_94 {dimension_numbers = #tpu.dot_dimension_numbers<[1], [0], [0], [1], [0, 0, 1, 1], [], []>} : vector<2x252xf32>, vector<252x128xf32>, vector<2x128xf32> -> vector<2x128xf32>
    %97 = arith.addf %90, %96 : vector<2x128xf32>
    %c6 = arith.constant 6 : index
    %c0_95 = arith.constant 0 : index
    %c0_96 = arith.constant 0 : index
    %98 = vector.load %arg7[%c6, %c0_95, %c0_96] : memref<7x2x32xf32, #tpu.memory_space<vmem>>, vector<1x2x32xf32>
    %99 = vector.shape_cast %98 : vector<1x2x32xf32> to vector<2x32xf32>
    %cst_97 = arith.constant dense<0.000000e+00> : vector<2x252xf32>
    %100 = tpu.matmul %99, %51, %cst_97 {dimension_numbers = #tpu.dot_dimension_numbers<[1], [0], [0], [1], [0, 0, 1, 1], [], []>} : vector<2x32xf32>, vector<32x252xf32>, vector<2x252xf32> -> vector<2x252xf32>
    %c6_98 = arith.constant 6 : index
    %c0_99 = arith.constant 0 : index
    %c0_100 = arith.constant 0 : index
    %101 = vector.load %arg8[%c6_98, %c0_99, %c0_100] : memref<7x252x128xf32, #tpu.memory_space<vmem>>, vector<1x252x128xf32>
    %102 = vector.shape_cast %101 : vector<1x252x128xf32> to vector<252x128xf32>
    %cst_101 = arith.constant dense<0.000000e+00> : vector<2x128xf32>
    %103 = tpu.matmul %100, %102, %cst_101 {dimension_numbers = #tpu.dot_dimension_numbers<[1], [0], [0], [1], [0, 0, 1, 1], [], []>} : vector<2x252xf32>, vector<252x128xf32>, vector<2x128xf32> -> vector<2x128xf32>
    %104 = arith.addf %97, %103 : vector<2x128xf32>
    %cst_102 = arith.constant 0.000000e+00 : f32
    %105 = vector.broadcast %cst_102 : f32 to vector<2x128xf32>
    %106 = arith.maximumf %104, %105 : vector<2x128xf32>
    %c0_103 = arith.constant 0 : index
    %c0_104 = arith.constant 0 : index
    %107 = vector.load %arg10[%c0_103, %c0_104] : memref<128x128xf32, #tpu.memory_space<vmem>>, vector<128x128xf32>
    %cst_105 = arith.constant dense<0.000000e+00> : vector<2x128xf32>
    %108 = tpu.matmul %106, %107, %cst_105 {dimension_numbers = #tpu.dot_dimension_numbers<[1], [0], [0], [1], [0, 0, 1, 1], [], []>} : vector<2x128xf32>, vector<128x128xf32>, vector<2x128xf32> -> vector<2x128xf32>
    %c0_106 = arith.constant 0 : index
    %c0_107 = arith.constant 0 : index
    %109 = vector.load %arg11[%c0_106, %c0_107] : memref<1x128xf32, #tpu.memory_space<vmem>>, vector<1x128xf32>
    %110 = vector.broadcast %109 : vector<1x128xf32> to vector<2x128xf32>
    %111 = arith.addf %108, %110 : vector<2x128xf32>
    %c0_108 = arith.constant 0 : index
    %c0_109 = arith.constant 0 : index
    %112 = vector.load %arg12[%c0_108, %c0_109] : memref<2x128xf32, #tpu.memory_space<vmem>>, vector<2x128xf32>
    tpu.vector_store %arg12[%c0_108, %c0_109], %111 {strides = array<i32>} : memref<2x128xf32, #tpu.memory_space<vmem>>, vector<2x128xf32>,
    return
  }
  func.func @transform_0(%arg0: i32) -> (i32, i32) {
    %c0_i32 = arith.constant 0 : i32
    %c0_i32_0 = arith.constant 0 : i32
    return %arg0, %c0_i32 : i32, i32
  }
  func.func @transform_1(%arg0: i32) -> (i32, i32) {
    %c0_i32 = arith.constant 0 : i32
    %c0_i32_0 = arith.constant 0 : i32
    %c0_i32_1 = arith.constant 0 : i32
    return %c0_i32, %c0_i32_0 : i32, i32
  }
  func.func @transform_2(%arg0: i32) -> (i32, i32, i32) {
    %c0_i32 = arith.constant 0 : i32
    %c0_i32_0 = arith.constant 0 : i32
    %c0_i32_1 = arith.constant 0 : i32
    %c0_i32_2 = arith.constant 0 : i32
    return %c0_i32, %c0_i32_0, %c0_i32_1 : i32, i32, i32
  }
  func.func @transform_3(%arg0: i32) -> (i32, i32) {
    %c0_i32 = arith.constant 0 : i32
    %c0_i32_0 = arith.constant 0 : i32
    %c0_i32_1 = arith.constant 0 : i32
    return %c0_i32, %c0_i32_0 : i32, i32
  }
  func.func @transform_4(%arg0: i32) -> (i32, i32, i32) {
    %c0_i32 = arith.constant 0 : i32
    %c0_i32_0 = arith.constant 0 : i32
    %c0_i32_1 = arith.constant 0 : i32
    %c0_i32_2 = arith.constant 0 : i32
    return %c0_i32, %c0_i32_0, %c0_i32_1 : i32, i32, i32
  }
  func.func @transform_5(%arg0: i32) -> (i32, i32) {
    %c0_i32 = arith.constant 0 : i32
    %c0_i32_0 = arith.constant 0 : i32
    %c0_i32_1 = arith.constant 0 : i32
    return %c0_i32, %c0_i32_0 : i32, i32
  }
  func.func @transform_6(%arg0: i32) -> (i32, i32, i32) {
    %c0_i32 = arith.constant 0 : i32
    %c0_i32_0 = arith.constant 0 : i32
    %c0_i32_1 = arith.constant 0 : i32
    %c0_i32_2 = arith.constant 0 : i32
    return %c0_i32, %c0_i32_0, %c0_i32_1 : i32, i32, i32
  }
  func.func @transform_7(%arg0: i32) -> (i32, i32, i32) {
    %c0_i32 = arith.constant 0 : i32
    %c0_i32_0 = arith.constant 0 : i32
    %c0_i32_1 = arith.constant 0 : i32
    %c0_i32_2 = arith.constant 0 : i32
    return %c0_i32, %c0_i32_0, %c0_i32_1 : i32, i32, i32
  }
  func.func @transform_8(%arg0: i32) -> (i32, i32) {
    %c0_i32 = arith.constant 0 : i32
    %c0_i32_0 = arith.constant 0 : i32
    %c0_i32_1 = arith.constant 0 : i32
    return %c0_i32, %c0_i32_0 : i32, i32
  }
  func.func @transform_9(%arg0: i32) -> (i32, i32) {
    %c0_i32 = arith.constant 0 : i32
    %c0_i32_0 = arith.constant 0 : i32
    %c0_i32_1 = arith.constant 0 : i32
    return %c0_i32, %c0_i32_0 : i32, i32
  }
  func.func @transform_10(%arg0: i32) -> (i32, i32) {
    %c0_i32 = arith.constant 0 : i32
    %c0_i32_0 = arith.constant 0 : i32
    %c0_i32_1 = arith.constant 0 : i32
    return %c0_i32, %c0_i32_0 : i32, i32
  }
  func.func @transform_11(%arg0: i32) -> (i32, i32) {
    %c0_i32 = arith.constant 0 : i32
    %c0_i32_0 = arith.constant 0 : i32
    return %arg0, %c0_i32 : i32, i32
  }
}

</mosaic_0001>

<bundles_post_ra>
// kernel: net_forward.1
= control target key start
LH: loop header
LB: loop body
LE: loop exit
PB: predicated region body
PF: predicated region fallthrough
CT: control target
= control target key end

     0   :  { %16 = vsyncpa [#allocation4], 0  ;;  %s3570_s0 = inlined_call_operand.vmem [shape: f32[32,16], index: 0, kind: input, shape index: {}]   ;;  %s3571_s1 = inlined_call_operand.vmem [shape: f32[32,1], index: 1, kind: input, shape index: {}]   ;;  %s3572_s2 = inlined_call_operand.vmem [shape: f32[3,16,224], index: 2, kind: input, shape index: {}]   ;;  %s3573_s3 = inlined_call_operand.vmem [shape: f32[1,224], index: 3, kind: input, shape index: {}]   ;;  %s3574_s4 = inlined_call_operand.hbm [shape: f32[3,208,252], index: 4, kind: input, shape index: {}]   ;;  %s3575_s5 = inlined_call_operand.vmem [shape: f32[1,252], index: 5, kind: input, shape index: {}]   ;;  %s3576_s6 = inlined_call_operand.hbm [shape: f32[7,2,32], index: 6, kind: input, shape index: {}]   ;;  %s3577_s7 = inlined_call_operand.hbm [shape: f32[7,252,128], index: 7, kind: input, shape index: {}]   ;;  %s3578_s8 = inlined_call_operand.vmem [shape: f32[1,128], index: 8, kind: input, shape index: {}]   ;;  %s3579_s9 = inlined_call_operand.vmem [shape: f32[128,128], index: 9, kind: input, shape index: {}]   ;;  %s3580_s10 = inlined_call_operand.vmem [shape: f32[1,128], index: 10, kind: input, shape index: {}]   ;;  %s3581_s11 = inlined_call_operand.hbm [shape: f32[2,128], index: 11, kind: output, shape index: {}]  }
   0x1   :  { %17 = vsyncpa [#allocation7], 0 }
   0x2   :  { %18 = vsyncpa [#allocation5], 0  ;;  %s3051_s17 = smov [#allocation6]  }
   0x3   :  { %s46_s18 = sshll.u32 %s3051_s17, 4  ;;  %s47_s18 = int_to_ptr.vmem [resolvable:$true] %s46_s18 }
   0x4   :  { %s2973_s19 = scalar_lea.vmem %s47_s18, 224  ;;  %p2978_p1 = scmp.lt.s32.totalorder %s47_s18, %s47_s18 }
   0x5   :  { %p2974_p0 = scmp.ne.s32.totalorder %s47_s18, %s2973_s19  ;;  %p2979_p2 = scmp.lt.s32.totalorder %s2973_s19, %s2973_s19 }
   0x7   :  { %p2980_p3 = por %p2979_p2, %p2978_p1 }
   0x9   :  { %p2981_p4 = pnand %p2980_p3, %p2974_p0 }
   0xb   :  { %2984 = shalt.err (!%p2981_p4)
}
   0xc   :  { %s3052_s20 = smov 32   ;;  %s3053_s21 = smov 2  }
   0xd   :  { %52 = dma.hbm_to_vmem [thread:$0]  %s3576_s6, 224, %s47_s18, [#allocation7], %s3052_s20, %s3052_s20, %s3053_s21  }
   0xe   :  { %s3054_s24 = smov [#allocation3]  }
   0xf   :  { %s32_s25 = sshll.u32 %s3054_s24, 4  ;;  %s33_s25 = int_to_ptr.vmem [resolvable:$true] %s32_s25 }
  0x10   :  { %s2993_s26 = scalar_lea.vmem %s33_s25, 19968  ;;  %p2998_p6 = scmp.lt.s32.totalorder %s33_s25, %s33_s25 }
  0x11   :  { %p2994_p5 = scmp.ne.s32.totalorder %s33_s25, %s2993_s26  ;;  %p2999_p7 = scmp.lt.s32.totalorder %s2993_s26, %s2993_s26 }
  0x13   :  { %p3000_p8 = por %p2999_p7, %p2998_p6 }
  0x15   :  { %p3001_p9 = pnand %p3000_p8, %p2994_p5 }
  0x17   :  { %3004 = shalt.err (!%p3001_p9)
}
  0x18   :  { %s3055_s27 = smov 256   ;;  %s3056_s28 = smov 16  }
  0x19   :  { %38 = dma.hbm_to_vmem [thread:$0]  %s3574_s4, 19968, %s33_s25, [#allocation4], %s3055_s27, %s3055_s27, %s3056_s28  }
  0x1a   :  { %s3057_s12 = smov [#allocation8]  }
  0x1b   :  { %s58_s13 = sshll.u32 %s3057_s12, 4  ;;  %s59_s13 = int_to_ptr.vmem [resolvable:$true] %s58_s13 }
  0x1c   :  { %s3013_s6 = scalar_lea.vmem %s59_s13, 28672  ;;  %p3018_p11 = scmp.lt.s32.totalorder %s59_s13, %s59_s13 }
  0x1d   :  { %p3014_p10 = scmp.ne.s32.totalorder %s59_s13, %s3013_s6  ;;  %p3019_p12 = scmp.lt.s32.totalorder %s3013_s6, %s3013_s6 }
  0x1f   :  { %p3020_p13 = por %p3019_p12, %p3018_p11 }
  0x21   :  { %p3021_p0 = pnand %p3020_p13, %p3014_p10 }
  0x23   :  { %3024 = shalt.err (!%p3021_p0)
}
  0x24   :  { %s3058_s14 = smov 128   ;;  %s3059_s15 = smov 8  }
  0x25   :  { %64 = dma.hbm_to_vmem [thread:$0]  %s3577_s7, 28672, %s59_s13, [#allocation7], %s3058_s14, %s3058_s14, %s3059_s15  }
  0x26   :  { %3045 = dma.done.wait [#allocation4], 19968  }
  0x27   :  { %3046 = vsyncadd [#allocation4], 4294947328 }
  0x28   :  { %3047 = dma.done.wait [#allocation7], 28896  }
  0x29   :  { %3048 = vsyncadd [#allocation7], 4294938400  ;;  %v3060_v0 = vmov 0.0   ;;  %v3061_v1 = vmov 0   ;;  %v2598_v2 = vld [vmem:[%s3572_s2 + $0x38] sm:$0xff]  ;;  %v2597_v4 = vld [vmem:[%s3572_s2 + $0x30] sm:$0xff] }
  0x2a   :  { %174 = vmatprep.mubr.f32.mxu0 %v3060_v0  ;;  %562 = vst [vmem:[#allocation2] sm:$0x3] %v3060_v0  ;;  %607 = vst [vmem:[#allocation2 + $0x30] sm:$0x80] %v3060_v0  ;;  %275 = vmatprep.mubr.f32.mxu1 %v3060_v0  ;;  %v87_v3 = vld [vmem:[%s3572_s2 + $0x18] sm:$0xff]  ;;  %v86_v5 = vld [vmem:[%s3572_s2 + $0x10] sm:$0xff] }
  0x2b   :  { %610 = vst [vmem:[#allocation2 + $0x40] sm:$0xff] %v3060_v0  ;;  %2961 = vset.pattern.permute.xlu0 %v3061_v1  ;;  %2962 = vset.pattern.permute.xlu1 %v3061_v1  ;;  %v2596_v6 = vld [vmem:[%s3572_s2 + $0x28] sm:$0xff]  ;;  %v2595_v8 = vld [vmem:[%s3572_s2 + $0x20] sm:$0xff]  ;;  %vm97_vm0 = vcmask 130048   ;;  %v2610_v12 = vld [vmem:[%s3572_s2 + $0x58] sm:$0xff]  ;;  %vm486_vm1 = vcmask 1046528  }
  0x2c   :  { %138 = vmatprep.subr.mxu0 %v2598_v2  ;;  %239 = vmatprep.subr.mxu1 %v87_v3  ;;  %v85_v7 = vld [vmem:[%s3572_s2 + $0x8] sm:$0xff]  ;;  %v84_v9 = vld [vmem:[%s3572_s2] sm:$0xff]  ;;  %v2609_v13 = vld [vmem:[%s3572_s2 + $0x50] sm:$0xff]  ;;  %vm563_vm2 = vcmask 648192   ;;  %vm600_vm3 = vcmask 654336   ;;  %vm608_vm4 = vcmask 654343  }
  0x2d   :  { %139 = vmatpush1.msra.mxu0 %v2597_v4  ;;  %240 = vmatpush1.msra.mxu1 %v86_v5  ;;  %v88_v10 = vld [vmem:[%s3570_s0 + $0x1] sm:$0xff]  ;;  %v89_v14 = vld [vmem:[%s3570_s0 + $0x9] sm:$0xff]  ;;  %v90_v20 = vld [vmem:[%s3570_s0 + $0x11] sm:$0xff]  ;;  %564 = vst.msk [vmem:[#allocation2 + $0x8] sm:$0x3] %vm563_vm2, %v3060_v0  ;;  %vm541_vm5 = vcmask 916480  }
  0x2e   :  { %140 = vmatprep.subr.mxu0 %v2596_v6  ;;  %241 = vmatprep.subr.mxu1 %v85_v7  ;;  %v80_v11 = vld [vmem:[%s3570_s0] sm:$0xff]  ;;  %v81_v15 = vld [vmem:[%s3570_s0 + $0x8] sm:$0xff]  ;;  %v448_v19 = vld [vmem:[%s3571_s1 + $0x10] sm:$0xff]  ;;  %611 = vst.msk [vmem:[#allocation2 + $0x48] sm:$0xff] %vm600_vm3, %v3060_v0  ;;  %vm597_vm6 = vcmask 654338   ;;  %vm573_vm7 = vcmask 1041408  }
  0x2f   :  { %141 = vmatpush1.msra.mxu0 %v2595_v8  ;;  %242 = vmatpush1.msra.mxu1 %v84_v9  ;;  %v2608_v16 = vld [vmem:[%s3572_s2 + $0x48] sm:$0xff]  ;;  %v446_v17 = vld [vmem:[%s3571_s1] sm:$0xff]  ;;  %v82_v21 = vld [vmem:[%s3570_s0 + $0x10] sm:$0xff]  ;;  %609 = vst.msk [vmem:[#allocation2 + $0x38] sm:$0x80] %vm608_vm4, %v3060_v0  ;;  %vm605_vm8 = vcmask 653312  }
  0x30   :  { %2599 = vmatmul.mubr.msk.f32.vlgmr.msra.gmra.mxu0 %vm97_vm0, %v88_v10  ;;  %2603 = vmatmul.mubr.msk.f32.vlgmr.msra.gmra.mxu1 %vm97_vm0, %v80_v11  ;;  %v2607_v18 = vld [vmem:[%s3572_s2 + $0x40] sm:$0xff]  ;;  %v447_v22 = vld [vmem:[%s3571_s1 + $0x8] sm:$0xff]  ;;  %v449_v23 = vld [vmem:[%s3571_s1 + $0x18] sm:$0x3f]  ;;  %vm739_vm9 = vcmask 1045504   ;;  %vm1018_vm10 = vcmask 1043456  }
  0x31   :  { %180 = vmatprep.mubr.f32.mxu0 %v3060_v0  ;;  %281 = vmatprep.mubr.f32.mxu1 %v3060_v0  ;;  %v91_v24 = vld [vmem:[%s3570_s0 + $0x19] sm:$0x3f]  ;;  %v300_v26 = vld [vmem:[%s3570_s0 + $0x2] sm:$0xff]  ;;  %v301_v27 = vld [vmem:[%s3570_s0 + $0xa] sm:$0xff]  ;;  %vm1183_vm11 = vcmask 261120   ;;  %vm1290_vm12 = vcmask 1014784  }
  0x32   :  { %349 = vmatprep.subr.mxu0 %v2610_v12  ;;  %452 = vperm.xlu0 %2961, %v446_v17   ;;  %v83_v25 = vld [vmem:[%s3570_s0 + $0x18] sm:$0x3f]  ;;  %v651_v30 = vld [vmem:[#allocation3 + $0xf8] sm:$0xff]  ;;  %v650_v31 = vld [vmem:[#allocation3 + $0xf0] sm:$0xff]  ;;  %vm3063_vm13 = vmmov 0   ;;  %s3064_s14 = smov [#allocation9]  }
  0x33   :  { %350 = vmatpush1.msra.mxu0 %v2609_v13  ;;  %462 = vperm.xlu1 %2962, %v448_v19   ;;  %v302_v28 = vld [vmem:[%s3570_s0 + $0x12] sm:$0xff]  ;;  %v303_v29 = vld [vmem:[%s3570_s0 + $0x1a] sm:$0x3f]  ;;  %v647_v34 = vld [vmem:[#allocation3 + $0xd8] sm:$0xff] }
  0x34   :  { %2600 = vmatmul.mubr.msk.f32.gmra.mxu0 %vm97_vm0, %v89_v14  ;;  %2604 = vmatmul.mubr.msk.f32.gmra.mxu1 %vm97_vm0, %v81_v15  ;;  %v649_v32 = vld [vmem:[#allocation3 + $0xe8] sm:$0xff]  ;;  %v648_v33 = vld [vmem:[#allocation3 + $0xe0] sm:$0xff]  ;;  %v708_v35 = vld [vmem:[#allocation3 + $0x298] sm:$0xff] }
  0x35   :  { %186 = vmatprep.mubr.f32.mxu0 %v3060_v0  ;;  %287 = vmatprep.mubr.f32.mxu1 %v3060_v0  ;;  %v646_v36 = vld [vmem:[#allocation3 + $0xd0] sm:$0xff]  ;;  %v706_v38 = vld [vmem:[#allocation3 + $0x288] sm:$0xff]  ;;  %v705_v40 = vld [vmem:[#allocation3 + $0x280] sm:$0xff] }
  0x36   :  { %351 = vmatprep.subr.mxu0 %v2608_v16  ;;  %457 = vperm.xlu0 %2961, %v447_v22   ;;  %v707_v37 = vld [vmem:[#allocation3 + $0x290] sm:$0xff]  ;;  %v645_v39 = vld [vmem:[#allocation3 + $0xc8] sm:$0xff]  ;;  %v644_v41 = vld [vmem:[#allocation3 + $0xc0] sm:$0xff] }
  0x37   :  { %352 = vmatpush1.msra.mxu0 %v2607_v18  ;;  %467 = vperm.xlu1 %2962, %v449_v23   ;;  %v704_v42 = vld [vmem:[#allocation3 + $0x278] sm:$0xff]  ;;  %v703_v43 = vld [vmem:[#allocation3 + $0x270] sm:$0xff]  ;;  %v702_v45 = vld [vmem:[#allocation3 + $0x268] sm:$0xff] }
  0x38   :  { %2601 = vmatmul.mubr.msk.f32.gmra.mxu0 %vm97_vm0, %v90_v20  ;;  %2605 = vmatmul.mubr.msk.f32.gmra.mxu1 %vm97_vm0, %v82_v21  ;;  %v643_v44 = vld [vmem:[#allocation3 + $0xb8] sm:$0xff]  ;;  %v642_v46 = vld [vmem:[#allocation3 + $0xb0] sm:$0xff]  ;;  %v701_v47 = vld [vmem:[#allocation3 + $0x260] sm:$0xff] }
  0x39   :  { %192 = vmatprep.mubr.f32.mxu0 %v3060_v0  ;;  %293 = vmatprep.mubr.f32.mxu1 %v3060_v0  ;;  %v641_v48 = vld [vmem:[#allocation3 + $0xa8] sm:$0xff]  ;;  %v700_v49 = vld [vmem:[#allocation3 + $0x258] sm:$0xff]  ;;  %v640_v50 = vld [vmem:[#allocation3 + $0xa0] sm:$0xff] }
  0x3a   :  { %868 = vmatprep.subr.mxu0 %v651_v30  ;;  %770 = vmatprep.subr.mxu1 %v708_v35  ;;  %v699_v51 = vld [vmem:[#allocation3 + $0x250] sm:$0xff]  ;;  %v639_v52 = vld [vmem:[#allocation3 + $0x98] sm:$0xff]  ;;  %v698_v53 = vld [vmem:[#allocation3 + $0x248] sm:$0xff] }
  0x3b   :  { %771 = vmatpush1.msra.mxu1 %v707_v37  ;;  %v638_v54 = vld [vmem:[#allocation3 + $0x90] sm:$0xff]  ;;  %v697_v55 = vld [vmem:[#allocation3 + $0x240] sm:$0xff]  ;;  %v637_v56 = vld [vmem:[#allocation3 + $0x88] sm:$0xff] }
  0x3c   :  { %2602 = vmatmul.mubr.msk.f32.gmra.mxu0 %vm97_vm0, %v91_v24  ;;  %2606 = vmatmul.mubr.msk.f32.gmra.mxu1 %vm97_vm0, %v83_v25  ;;  %v696_v57 = vld [vmem:[#allocation3 + $0x238] sm:$0xff]  ;;  %v636_v58 = vld [vmem:[#allocation3 + $0x80] sm:$0xff]  ;;  %v695_v59 = vld [vmem:[#allocation3 + $0x230] sm:$0xff] }
  0x3d   :  { %385 = vmatprep.mubr.f32.mxu0 %v3060_v0  ;;  %772 = vmatprep.subr.mxu1 %v706_v38  ;;  %v635_v60 = vld [vmem:[#allocation3 + $0x78] sm:$0xff]  ;;  %v694_v61 = vld [vmem:[#allocation3 + $0x228] sm:$0xff]  ;;  %v634_v62 = vld [vmem:[#allocation3 + $0x70] sm:$0xff]  ;;  %v420_v38 = vlaneseq }
  0x3e   :  { %773 = vmatpush1.msra.mxu1 %v705_v40  ;;  %v693_v63 = vld [vmem:[#allocation3 + $0x220] sm:$0xff]  ;;  %v633_v1 = vld [vmem:[#allocation3 + $0x68] sm:$0xff]  ;;  %v692_v2 = vld [vmem:[#allocation3 + $0x218] sm:$0xff] }
  0x3f   :  { %774 = vmatprep.subr.mxu1 %v704_v42  ;;  %v632_v3 = vld [vmem:[#allocation3 + $0x60] sm:$0xff]  ;;  %v691_v4 = vld [vmem:[#allocation3 + $0x210] sm:$0xff]  ;;  %v631_v5 = vld [vmem:[#allocation3 + $0x58] sm:$0xff]  ;;  %v3245_v42 = vshrl.u32 %v420_v38, 7 }
  0x40   :  { %2611 = vmatmul.mubr.msk.f32.vlgmr.msra.gmra.mxu0 %vm97_vm0, %v300_v26  ;;  %775 = vmatpush1.msra.mxu1 %v703_v43  ;;  %v690_v6 = vld [vmem:[#allocation3 + $0x208] sm:$0xff]  ;;  %v630_v7 = vld [vmem:[#allocation3 + $0x50] sm:$0xff]  ;;  %v689_v8 = vld [vmem:[#allocation3 + $0x200] sm:$0xff] }
  0x41   :  { %391 = vmatprep.mubr.f32.mxu0 %v3060_v0  ;;  %869 = vmatpush1.msra.mxu0 %v650_v31  ;;  %v629_v9 = vld [vmem:[#allocation3 + $0x48] sm:$0xff]  ;;  %v688_v10 = vld [vmem:[#allocation3 + $0x1f8] sm:$0xff]  ;;  %v628_v11 = vld [vmem:[#allocation3 + $0x40] sm:$0xff] }
  0x42   :  { %870 = vmatprep.subr.mxu0 %v649_v32  ;;  %776 = vmatprep.subr.mxu1 %v702_v45  ;;  %v687_v12 = vld [vmem:[#allocation3 + $0x1f0] sm:$0xff]  ;;  %v627_v13 = vld [vmem:[#allocation3 + $0x38] sm:$0xff]  ;;  %v686_v14 = vld [vmem:[#allocation3 + $0x1e8] sm:$0xff] }
  0x43   :  { %871 = vmatpush1.msra.mxu0 %v648_v33  ;;  %777 = vmatpush1.msra.mxu1 %v701_v47  ;;  %v626_v15 = vld [vmem:[#allocation3 + $0x30] sm:$0xff]  ;;  %v685_v16 = vld [vmem:[#allocation3 + $0x1e0] sm:$0xff]  ;;  %v625_v17 = vld [vmem:[#allocation3 + $0x28] sm:$0xff] }
  0x44   :  { %2612 = vmatmul.mubr.msk.f32.gmra.mxu0 %vm97_vm0, %v301_v27  ;;  %872 = vmatprep.subr.mxu0 %v647_v34  ;;  %v684_v18 = vld [vmem:[#allocation3 + $0x1d8] sm:$0xff]  ;;  %v624_v19 = vld [vmem:[#allocation3 + $0x20] sm:$0xff]  ;;  %v683_v20 = vld [vmem:[#allocation3 + $0x1d0] sm:$0xff] }
  0x45   :  { %397 = vmatprep.mubr.f32.mxu0 %v3060_v0  ;;  %873 = vmatpush1.msra.mxu0 %v646_v36  ;;  %v623_v21 = vld [vmem:[#allocation3 + $0x18] sm:$0xff]  ;;  %v682_v22 = vld [vmem:[#allocation3 + $0x1c8] sm:$0xff]  ;;  %v622_v23 = vld [vmem:[#allocation3 + $0x10] sm:$0xff] }
  0x46   :  { %874 = vmatprep.subr.mxu0 %v645_v39  ;;  %778 = vmatprep.subr.mxu1 %v700_v49  ;;  %v681_v24 = vld [vmem:[#allocation3 + $0x1c0] sm:$0xff]  ;;  %v621_v25 = vld [vmem:[#allocation3 + $0x8] sm:$0xff]  ;;  %v680_v26 = vld [vmem:[#allocation3 + $0x1b8] sm:$0xff] }
  0x47   :  { %875 = vmatpush1.msra.mxu0 %v644_v41  ;;  %779 = vmatpush1.msra.mxu1 %v699_v51  ;;  %v620_v27 = vld [vmem:[#allocation3] sm:$0xff]  ;;  %v670_v30 = vld [vmem:[#allocation3 + $0x190] sm:$0xff]  ;;  %v669_v31 = vld [vmem:[#allocation3 + $0x188] sm:$0xff] }
  0x48   :  { %2613 = vmatmul.mubr.msk.f32.gmra.mxu0 %vm97_vm0, %v302_v28  ;;  %876 = vmatprep.subr.mxu0 %v643_v44  ;;  %v679_v28 = vld [vmem:[#allocation3 + $0x1b0] sm:$0xff]  ;;  %v668_v32 = vld [vmem:[#allocation3 + $0x180] sm:$0xff]  ;;  %v667_v33 = vld [vmem:[#allocation3 + $0x178] sm:$0xff] }
  0x49   :  { %403 = vmatprep.mubr.f32.mxu0 %v3060_v0  ;;  %877 = vmatpush1.msra.mxu0 %v642_v46  ;;  %v422_v46 = vsub.s32 0, %v3245_v42  ;;  %v660_v38 = vld [vmem:[#allocation3 + $0x140] sm:$0xff] }
  0x4a   :  { %878 = vmatprep.subr.mxu0 %v641_v48  ;;  %780 = vmatprep.subr.mxu1 %v698_v53  ;;  %v418_v48 = vld [vmem:[%s3573_s3] sm:$0x3]  ;;  %s3062_s3 = smov 112  }
  0x4b   :  { %879 = vmatpush1.msra.mxu0 %v640_v50  ;;  %781 = vmatpush1.msra.mxu1 %v697_v55  ;;  %v426_v50 = vsub.s32 1, %v3245_v42  ;;  %v3256_v53 = vrot.slane %v418_v48, %v422_v46 }
  0x4c   :  { %2614 = vmatmul.mubr.msk.f32.gmra.mxu0 %vm97_vm0, %v303_v29  ;;  %880 = vmatprep.subr.mxu0 %v639_v52  ;;  %v671_v29 = vld [vmem:[#allocation3 + $0x198] sm:$0xff] }
  0x4d   :  { %881 = vmatpush1.msra.mxu0 %v638_v54  ;;  %782 = vmatprep.subr.mxu1 %v696_v57 }
  0x4e   :  { %882 = vmatprep.subr.mxu0 %v637_v56  ;;  %783 = vmatpush1.msra.mxu1 %v695_v59 }
  0x4f   :  { %883 = vmatpush1.msra.mxu0 %v636_v58  ;;  %784 = vmatprep.subr.mxu1 %v694_v61  ;;  %v3260_v58 = vrot.slane %v418_v48, %v426_v50  ;;  %v659_v48 = vld [vmem:[#allocation3 + $0x138] sm:$0xff] }
  0x50   :  { %884 = vmatprep.subr.mxu0 %v635_v60  ;;  %785 = vmatpush1.msra.mxu1 %v693_v63 }
  0x51   :  { %885 = vmatpush1.msra.mxu0 %v634_v62  ;;  %786 = vmatprep.subr.mxu1 %v692_v2 }
  0x52   :  { %886 = vmatprep.subr.mxu0 %v633_v1  ;;  %787 = vmatpush1.msra.mxu1 %v691_v4 }
  0x53   :  { %887 = vmatpush1.msra.mxu0 %v632_v3  ;;  %788 = vmatprep.subr.mxu1 %v690_v6  ;;  %v678_v6 = vld [vmem:[#allocation3 + $0x1a8] sm:$0xff] }
  0x54   :  { %888 = vmatprep.subr.mxu0 %v631_v5  ;;  %789 = vmatpush1.msra.mxu1 %v689_v8  ;;  %v677_v8 = vld [vmem:[#allocation3 + $0x1a0] sm:$0xff] }
  0x55   :  { %889 = vmatpush1.msra.mxu0 %v630_v7  ;;  %790 = vmatprep.subr.mxu1 %v688_v10  ;;  %v666_v7 = vld [vmem:[#allocation3 + $0x170] sm:$0xff] }
  0x56   :  { %890 = vmatprep.subr.mxu0 %v629_v9  ;;  %791 = vmatpush1.msra.mxu1 %v687_v12 }
  0x57   :  { %891 = vmatpush1.msra.mxu0 %v628_v11  ;;  %792 = vmatprep.subr.mxu1 %v686_v14  ;;  %v665_v11 = vld [vmem:[#allocation3 + $0x168] sm:$0xff]  ;;  %v728_v14 = vld [vmem:[#allocation3 + $0x338] sm:$0xff] }
  0x58   :  { %892 = vmatprep.subr.mxu0 %v627_v13  ;;  %793 = vmatpush1.msra.mxu1 %v685_v16 }
  0x59   :  { %893 = vmatpush1.msra.mxu0 %v626_v15  ;;  %794 = vmatprep.subr.mxu1 %v684_v18  ;;  %v664_v15 = vld [vmem:[#allocation3 + $0x160] sm:$0xff] }
  0x5a   :  { %894 = vmatprep.subr.mxu0 %v625_v17  ;;  %795 = vmatpush1.msra.mxu1 %v683_v20  ;;  %v663_v20 = vld [vmem:[#allocation3 + $0x158] sm:$0xff] }
  0x5b   :  { %895 = vmatpush1.msra.mxu0 %v624_v19  ;;  %796 = vmatprep.subr.mxu1 %v682_v22  ;;  %v727_v19 = vld [vmem:[#allocation3 + $0x330] sm:$0xff] }
  0x5c   :  { %896 = vmatprep.subr.mxu0 %v623_v21  ;;  %797 = vmatpush1.msra.mxu1 %v681_v24 }
  0x5d   :  { %897 = vmatpush1.msra.mxu0 %v622_v23  ;;  %798 = vmatprep.subr.mxu1 %v680_v26  ;;  %v662_v26 = vld [vmem:[#allocation3 + $0x150] sm:$0xff] }
  0x5e   :  { %898 = vmatprep.subr.mxu0 %v621_v25  ;;  %799 = vmatpush1.msra.mxu1 %v679_v28  ;;  %v726_v25 = vld [vmem:[#allocation3 + $0x328] sm:$0xff] }
  0x5f   :  { %899 = vmatpush1.msra.mxu0 %v620_v27  ;;  %800 = vmatprep.subr.mxu1 %v678_v6 }
  0x60   :  { %912 = vmatprep.subr.mxu0 %v671_v29  ;;  %801 = vmatpush1.msra.mxu1 %v677_v8  ;;  %v719_v8 = vld [vmem:[#allocation3 + $0x2f0] sm:$0xff] }
  0x61   :  { %913 = vmatpush2.msra.mxu0 %v670_v30  ;;  %814 = vmatprep.subr.mxu1 %v728_v14  ;;  %v654_v14 = vld [vmem:[#allocation3 + $0x110] sm:$0xff] }
  0x62   :  { %914 = vmatprep.subr.mxu0 %v669_v31  ;;  %815 = vmatpush2.msra.mxu1 %v727_v19  ;;  %v725_v31 = vld [vmem:[#allocation3 + $0x320] sm:$0xff]  ;;  %v653_v19 = vld [vmem:[#allocation3 + $0x108] sm:$0xff] }
  0x63   :  { %915 = vmatpush2.msra.mxu0 %v668_v32  ;;  %816 = vmatprep.subr.mxu1 %v726_v25  ;;  %v661_v32 = vld [vmem:[#allocation3 + $0x148] sm:$0xff] }
  0x64   :  { %916 = vmatprep.subr.mxu0 %v667_v33  ;;  %817 = vmatpush2.msra.mxu1 %v725_v31  ;;  %v714_v31 = vld [vmem:[#allocation3 + $0x2c8] sm:$0xff] }
  0x65   :  { %917 = vmatpush2.msra.mxu0 %v666_v7 }
  0x66   :  { %918 = vmatprep.subr.mxu0 %v665_v11 }
  0x67   :  { %919 = vmatpush2.msra.mxu0 %v664_v15 }
  0x68   :  { %920 = vmatprep.subr.mxu0 %v663_v20 }
  0x69   :  { %921 = vmatpush2.msra.mxu0 %v662_v26  ;;  %v715_v26 = vld [vmem:[#allocation3 + $0x2d0] sm:$0xff] }
  0x6a   :  { %922 = vmatprep.subr.mxu0 %v661_v32 }
  0x6b   :  { %923 = vmatpush2.msra.mxu0 %v660_v38 }
  0x6c   :  { %924 = vmatprep.subr.mxu0 %v659_v48 }
  0xad   :  { %v453_v63 = vpop.permute.xlu0 %452 }
  0xb1   :  { %v458_v28 = vpop.permute.xlu0 %457 }
  0xf0   :  { %v176_v34 = vpop.f32.mrf.mxu0  ;;  %v277_v35 = vpop.f32.mrf.mxu1 }
  0xf1   :  { %v278_v52 = vadd.f32 %v277_v35, %v176_v34 }
  0xf2   :  { %v178_v36 = vpop.f32.mrf.mxu0  ;;  %v279_v37 = vpop.f32.mrf.mxu1 }
  0xf3   :  { %v280_v55 = vadd.f32 %v279_v37, %v178_v36  ;;  %v724_v37 = vld [vmem:[#allocation3 + $0x318] sm:$0xff] }
  0xf4   :  { %v182_v39 = vpop.f32.mrf.mxu0  ;;  %v283_v40 = vpop.f32.mrf.mxu1  ;;  %818 = vmatprep.subr.mxu1 %v724_v37  ;;  %v712_v37 = vld [vmem:[#allocation3 + $0x2b8] sm:$0xff] }
  0xf5   :  { %v284_v60 = vadd.f32 %v283_v40, %v182_v39 }
  0xf6   :  { %v184_v41 = vpop.f32.mrf.mxu0  ;;  %v285_v44 = vpop.f32.mrf.mxu1 }
  0xf7   :  { %v286_v2 = vadd.f32 %v285_v44, %v184_v41 }
  0xf8   :  { %v188_v43 = vpop.f32.mrf.mxu0  ;;  %v289_v49 = vpop.f32.mrf.mxu1 }
  0xf9   :  { %v290_v16 = vadd.f32 %v289_v49, %v188_v43  ;;  %v463_v43 = vpop.permute.xlu1 %462 }
  0xfa   :  { %v190_v45 = vpop.f32.mrf.mxu0  ;;  %v291_v56 = vpop.f32.mrf.mxu1 }
  0xfb   :  { %v292_v21 = vadd.f32 %v291_v56, %v190_v45  ;;  %v723_v45 = vld [vmem:[#allocation3 + $0x310] sm:$0xff] }
  0xfc   :  { %v194_v47 = vpop.f32.mrf.mxu0  ;;  %v295_v3 = vpop.f32.mrf.mxu1  ;;  %819 = vmatpush2.msra.mxu1 %v723_v45 }
  0xfd   :  { %v296_v33 = vadd.f32 %v295_v3, %v194_v47  ;;  %v720_v3 = vld [vmem:[#allocation3 + $0x2f8] sm:$0xff] }
  0xfe   :  { %v3252_v51 = vpop.f32.mrf.mxu0  ;;  %v297_v22 = vpop.f32.mrf.mxu1 }
  0xff   :  { %v298_v39 = vadd.f32 %v297_v22, %v3252_v51  ;;  %v722_v51 = vld [vmem:[#allocation3 + $0x308] sm:$0xff] }
 0x100   :  { %v387_v54 = vpop.f32.mrf.mxu0  ;;  %820 = vmatprep.subr.mxu1 %v722_v51 }
 0x101   :  { %v410_v57 = vadd.f32 %v387_v54, %v278_v52 }
 0x102   :  { %v389_v59 = vpop.f32.mrf.mxu0 }
 0x103   :  { %v430_v61 = vadd.f32 %v3256_v53, %v410_v57  ;;  %v411_v62 = vadd.f32 %v389_v59, %v280_v55  ;;  %v658_v55 = vld [vmem:[#allocation3 + $0x130] sm:$0xff] }
 0x104   :  { %v393_v1 = vpop.f32.mrf.mxu0  ;;  %925 = vmatpush2.msra.mxu0 %v658_v55 }
 0x105   :  { %v431_v4 = vadd.f32 %v3260_v58, %v411_v62  ;;  %v412_v5 = vadd.f32 %v393_v1, %v284_v60  ;;  %v438_v9 = vmax.f32 %v430_v61, 0.0  ;;  %v721_v60 = vld [vmem:[#allocation3 + $0x300] sm:$0xff]  ;;  %v657_v61 = vld [vmem:[#allocation3 + $0x128] sm:$0xff] }
 0x106   :  { %v395_v10 = vpop.f32.mrf.mxu0  ;;  %821 = vmatpush2.msra.mxu1 %v721_v60  ;;  %926 = vmatprep.subr.mxu0 %v657_v61 }
 0x107   :  { %v432_v12 = vadd.f32 %v3256_v53, %v412_v5  ;;  %v413_v13 = vadd.f32 %v395_v10, %v286_v2  ;;  %v439_v17 = vmax.f32 %v431_v4, 0.0  ;;  %v3266_v27 = vmul.f32 %v453_v63, %v438_v9  ;;  %v656_v4 = vld [vmem:[#allocation3 + $0x120] sm:$0xff]  ;;  %822 = vmatprep.subr.mxu1 %v720_v3  ;;  %v655_v9 = vld [vmem:[#allocation3 + $0x118] sm:$0xff] }
 0x108   :  { %v399_v18 = vpop.f32.mrf.mxu0  ;;  %927 = vmatpush2.msra.mxu0 %v656_v4  ;;  %823 = vmatpush2.msra.mxu1 %v719_v8 }
 0x109   :  { %v440_v23 = vmax.f32 %v432_v12, 0.0  ;;  %v433_v24 = vadd.f32 %v3260_v58, %v413_v13  ;;  %v414_v29 = vadd.f32 %v399_v18, %v290_v16  ;;  %v471_v40 = vmul.f32 %v453_v63, %v439_v17  ;;  %928 = vmatprep.subr.mxu0 %v655_v9  ;;  %v718_v13 = vld [vmem:[#allocation3 + $0x2e8] sm:$0xff]  ;;  %v468_v16 = vpop.permute.xlu1 %467  ;;  %v717_v18 = vld [vmem:[#allocation3 + $0x2e0] sm:$0xff] }
 0x10a   :  { %v401_v30 = vpop.f32.mrf.mxu0  ;;  %v487_v56 = vrot.slane %v3266_v27, 1  ;;  %824 = vmatprep.subr.mxu1 %v718_v13  ;;  %929 = vmatpush2.msra.mxu0 %v654_v14 }
 0x10b   :  { %v441_v34 = vmax.f32 %v433_v24, 0.0  ;;  %v3268_v35 = vmul.f32 %v458_v28, %v440_v23  ;;  %v415_v36 = vadd.f32 %v401_v30, %v292_v21  ;;  %v434_v41 = vadd.f32 %v3256_v53, %v414_v29  ;;  %825 = vmatpush2.msra.mxu1 %v717_v18  ;;  %v716_v23 = vld [vmem:[#allocation3 + $0x2d8] sm:$0xff]  ;;  %v652_v24 = vld [vmem:[#allocation3 + $0x100] sm:$0xff]  ;;  %930 = vmatprep.subr.mxu0 %v653_v19 }
 0x10c   :  { %v405_v44 = vpop.f32.mrf.mxu0  ;;  %v490_v5 = vrot.slane %v471_v40, 1  ;;  %826 = vmatprep.subr.mxu1 %v716_v23  ;;  %931 = vmatpush2.msra.mxu0 %v652_v24 }
 0x10d   :  { %v3272_v47 = vmul.f32 %v458_v28, %v441_v34  ;;  %v488_v49 = vrot.slane %v3268_v35, 1  ;;  %v435_v52 = vadd.f32 %v3260_v58, %v415_v36  ;;  %v416_v54 = vadd.f32 %v405_v44, %v296_v33  ;;  %827 = vmatpush2.msra.mxu1 %v715_v26  ;;  %v713_v33 = vld [vmem:[#allocation3 + $0x2c0] sm:$0xff]  ;;  %v993_v44 = vld [vmem:[#allocation3 + $0x438] sm:$0xff] }
 0x10e   :  { %v442_v57 = vmax.f32 %v434_v41, 0.0  ;;  %v407_v59 = vpop.f32.mrf.mxu0  ;;  %828 = vmatprep.subr.mxu1 %v714_v31 }
 0x10f   :  { %v491_v62 = vrot.slane %v3272_v47, 1  ;;  %v443_v63 = vmax.f32 %v435_v52, 0.0  ;;  %v436_v1 = vadd.f32 %v3256_v53, %v416_v54  ;;  %v417_v2 = vadd.f32 %v407_v59, %v298_v39  ;;  %829 = vmatpush2.msra.mxu1 %v713_v33  ;;  %v711_v39 = vld [vmem:[#allocation3 + $0x2b0] sm:$0xff]  ;;  %v991_v33 = vld [vmem:[#allocation3 + $0x428] sm:$0xff] }
 0x110   :  { %v474_v6 = vmul.f32 %v463_v43, %v442_v57  ;;  %v489_v7 = vsel %vm486_vm1, %v487_v56, %v488_v49  ;;  %830 = vmatprep.subr.mxu1 %v712_v37  ;;  %v989_v37 = vld [vmem:[#allocation3 + $0x418] sm:$0xff] }
 0x111   :  { %v475_v10 = vmul.f32 %v463_v43, %v443_v63  ;;  %v444_v11 = vmax.f32 %v436_v1, 0.0  ;;  %v437_v53 = vadd.f32 %v3260_v58, %v417_v2  ;;  %v3285_v12 = vmax.f32 %v3266_v27, %v489_v7  ;;  %831 = vmatpush2.msra.mxu1 %v711_v39  ;;  %v709_v43 = vld [vmem:[#allocation3 + $0x2a0] sm:$0xff] }
 0x112   :  { %v493_v15 = vrot.slane %v474_v6, 1  ;;  %v492_v17 = vsel %vm486_vm1, %v490_v5, %v491_v62 }
 0x113   :  { %v495_v20 = vrot.slane %v475_v10, 1  ;;  %v445_v21 = vmax.f32 %v437_v53, 0.0  ;;  %v476_v22 = vmul.f32 %v468_v16, %v444_v11  ;;  %525 = vrot.lane.b32.xlu0 %v3285_v12, %s3062_s3  ;;  %v510_v58 = vmax.f32 %v471_v40, %v492_v17  ;;  %v710_v40 = vld [vmem:[#allocation3 + $0x2a8] sm:$0xff] }
 0x114   :  { %v494_v25 = vsel %vm486_vm1, %v488_v49, %v493_v15  ;;  %832 = vmatprep.subr.mxu1 %v710_v40 }
 0x115   :  { %v477_v27 = vmul.f32 %v468_v16, %v445_v21  ;;  %v497_v28 = vrot.slane %v476_v22, 1  ;;  %527 = vrot.lane.b32.xlu1 %v510_v58, %s3062_s3  ;;  %v511_v29 = vmax.f32 %v3268_v35, %v494_v25  ;;  %v496_v30 = vsel %vm486_vm1, %v491_v62, %v495_v20  ;;  %833 = vmatpush2.msra.mxu1 %v709_v43  ;;  %v987_v43 = vld [vmem:[#allocation3 + $0x408] sm:$0xff] }
 0x116   :  { %v512_v32 = vmax.f32 %v3272_v47, %v496_v30  ;;  %1049 = vmatprep.subr.mxu1 %v993_v44 }
 0x117   :  { %v499_v34 = vrot.slane %v477_v27, 1  ;;  %529 = vrot.lane.b32.xlu0 %v511_v29, %s3062_s3  ;;  %v498_v36 = vsel %vm486_vm1, %v493_v15, %v497_v28  ;;  %v515_v45 = vmax.f32 %v476_v22, %v497_v28 }
 0x118   :  { %v513_v38 = vmax.f32 %v474_v6, %v498_v36  ;;  %v990_v36 = vld [vmem:[#allocation3 + $0x420] sm:$0xff] }
 0x119   :  { %531 = vrot.lane.b32.xlu1 %v512_v32, %s3062_s3  ;;  %v500_v35 = vsel %vm486_vm1, %v495_v20, %v499_v34  ;;  %v516_v48 = vmax.f32 %v477_v27, %v499_v34 }
 0x11a   :  { %v514_v41 = vmax.f32 %v475_v10, %v500_v35  ;;  %v988_v35 = vld [vmem:[#allocation3 + $0x410] sm:$0xff] }
 0x11b   :  { %533 = vrot.lane.b32.xlu0 %v513_v38, %s3062_s3 }
 0x11d   :  { %535 = vrot.lane.b32.xlu1 %v514_v41, %s3062_s3 }
 0x11f   :  { %537 = vrot.lane.b32.xlu0 %v515_v45, %s3062_s3 }
 0x121   :  { %539 = vrot.lane.b32.xlu1 %v516_v48, %s3062_s3 }
 0x185   :  { %v526_v47 = vpop.permute.xlu0 %525 }
 0x187   :  { %v528_v49 = vpop.permute.xlu1 %527 }
 0x188   :  { %v542_v52 = vsel %vm541_vm5, %v526_v47, %v528_v49  ;;  %v555_v0 = vmax.f32 %v510_v58, %v528_v49  ;;  %v674_v49 = vld [vmem:[#allocation2 + $0x40] sm:$0x3] }
 0x189   :  { %v554_v54 = vmax.f32 %v3285_v12, %v542_v52  ;;  %v530_v51 = vpop.permute.xlu0 %529 }
 0x18a   :  { %v575_v55 = vrot.slane %v555_v0, 6  ;;  %v985_v0 = vld [vmem:[#allocation3 + $0x3f8] sm:$0xff] }
 0x18b   :  { %v574_v56 = vrot.slane %v554_v54, 6  ;;  %v532_v57 = vpop.permute.xlu1 %531 }
 0x18c   :  { %598 = vst.msk [vmem:[#allocation2 + $0x8] sm:$0xfc] %vm597_vm6, %v575_v55  ;;  %v543_v59 = vsel %vm541_vm5, %v530_v51, %v532_v57  ;;  %v557_v60 = vmax.f32 %v512_v32, %v532_v57  ;;  %v984_v51 = vld [vmem:[#allocation3 + $0x3f0] sm:$0xff]  ;;  %v754_v57 = vrot.slane %v674_v49, 2 }
 0x18d   :  { %596 = vst [vmem:[#allocation2] sm:$0xfc] %v574_v56  ;;  %v556_v61 = vmax.f32 %v511_v29, %v543_v59  ;;  %v534_v62 = vpop.permute.xlu0 %533  ;;  %v992_v29 = vld [vmem:[#allocation3 + $0x430] sm:$0xff] }
 0x18e   :  { %v578_v63 = vrot.slane %v557_v60, 6 }
 0x18f   :  { %v576_v1 = vrot.slane %v556_v61, 6  ;;  %v536_v2 = vpop.permute.xlu1 %535 }
 0x190   :  { %v579_v3 = vsel %vm573_vm7, %v575_v55, %v578_v63  ;;  %v544_v4 = vsel %vm541_vm5, %v534_v62, %v536_v2  ;;  %v559_v5 = vmax.f32 %v514_v41, %v536_v2  ;;  %v982_v62 = vld [vmem:[#allocation3 + $0x3e0] sm:$0xff] }
 0x191   :  { %v3310_v6 = vsel %vm573_vm7, %v574_v56, %v576_v1  ;;  %601 = vst.msk [vmem:[#allocation2 + $0x18] sm:$0xff] %vm600_vm3, %v579_v3  ;;  %v558_v7 = vmax.f32 %v513_v38, %v544_v4  ;;  %v538_v10 = vpop.permute.xlu0 %537  ;;  %v675_v38 = vld [vmem:[#allocation2 + $0x48] sm:$0x3]  ;;  %v983_v56 = vld [vmem:[#allocation3 + $0x3e8] sm:$0xff] }
 0x192   :  { %v582_v8 = vrot.slane %v559_v5, 6  ;;  %v741_v27 = vrot.slane %v3310_v6, 2  ;;  %v756_v47 = vrot.slane %v675_v38, 2  ;;  %v979_v4 = vld [vmem:[#allocation3 + $0x3c8] sm:$0xff]  ;;  %v1001_v38 = vld [vmem:[#allocation3 + $0x478] sm:$0xff] }
 0x193   :  { %v580_v9 = vrot.slane %v558_v7, 6  ;;  %v540_v11 = vpop.permute.xlu1 %539  ;;  %v613_v53 = vld [vmem:[#allocation2 + $0x8] sm:$0xff]  ;;  %v978_v7 = vld [vmem:[#allocation3 + $0x3c0] sm:$0xff] }
 0x194   :  { %v583_v12 = vsel %vm573_vm7, %v578_v63, %v582_v8  ;;  %v545_v13 = vsel %vm541_vm5, %v538_v10, %v540_v11  ;;  %v561_v14 = vmax.f32 %v516_v48, %v540_v11  ;;  %2619 = vmatprep.mubr.msk.f32.mxu0 %vm600_vm3, %v613_v53  ;;  %v612_v15 = vld [vmem:[#allocation2] sm:$0xff]  ;;  %v673_v20 = vld [vmem:[#allocation2 + $0x8] sm:$0xfc]  ;;  %v986_v48 = vld [vmem:[#allocation3 + $0x400] sm:$0xff] }
 0x195   :  { %v3317_v16 = vsel %vm573_vm7, %v576_v1, %v580_v9  ;;  %603 = vst.msk [vmem:[#allocation2 + $0x28] sm:$0xff] %vm600_vm3, %v583_v12  ;;  %v560_v17 = vmax.f32 %v515_v45, %v545_v13  ;;  %933 = vmatmul.mubr.f32.vlgmr.msra.gmra.mxu0 %v612_v15  ;;  %v672_v18 = vld [vmem:[#allocation2] sm:$0xfc]  ;;  %v743_v26 = vrot.slane %v673_v20, 2  ;;  %v958_v59 = vld [vmem:[#allocation2 + $0x8] sm:$0xf0] }
 0x196   :  { %v586_v19 = vrot.slane %v561_v14, 6  ;;  %v740_v23 = vrot.slane %v672_v18, 2  ;;  %v746_v32 = vrot.slane %v3317_v16, 2  ;;  %v981_v63 = vld [vmem:[#allocation3 + $0x3d8] sm:$0xff]  ;;  %v980_v1 = vld [vmem:[#allocation3 + $0x3d0] sm:$0xff]  ;;  %v1022_v2 = vrot.slane %v958_v59, 4 }
 0x197   :  { %v584_v21 = vrot.slane %v560_v17, 6  ;;  %v975_v10 = vld [vmem:[#allocation3 + $0x3a8] sm:$0xff]  ;;  %v974_v11 = vld [vmem:[#allocation3 + $0x3a0] sm:$0xff]  ;;  %v973_v53 = vld [vmem:[#allocation3 + $0x398] sm:$0xff] }
 0x198   :  { %v587_v22 = vsel %vm573_vm7, %v582_v8, %v586_v19  ;;  %v3321_v58 = vld [vmem:[#allocation2 + $0x18] sm:$0xff]  ;;  %v742_v30 = vsel %vm739_vm9, %v740_v23, %v741_v27  ;;  %v747_v40 = vsel %vm739_vm9, %v741_v27, %v746_v32  ;;  %v977_v8 = vld [vmem:[#allocation3 + $0x3b8] sm:$0xff]  ;;  %v972_v12 = vld [vmem:[#allocation3 + $0x390] sm:$0xff] }
 0x199   :  { %v585_v24 = vsel %vm573_vm7, %v580_v9, %v584_v21  ;;  %606 = vst.msk [vmem:[#allocation2 + $0x38] sm:$0x7f] %vm605_vm8, %v587_v22  ;;  %v744_v25 = vrot.slane %v3321_v58, 2  ;;  %2620 = vmatprep.mubr.msk.f32.mxu0 %vm600_vm3, %v3321_v58  ;;  %v1023_v60 = vrot.slane %v3321_v58, 4  ;;  %v976_v9 = vld [vmem:[#allocation3 + $0x3b0] sm:$0xff]  ;;  %v971_v13 = vld [vmem:[#allocation3 + $0x388] sm:$0xff] }
 0x19a   :  { %604 = vst [vmem:[#allocation2 + $0x30] sm:$0x7f] %v585_v24  ;;  %939 = vmatmul.mubr.f32.gmra.mxu0 %v3310_v6  ;;  %v970_v14 = vld [vmem:[#allocation3 + $0x380] sm:$0xff]  ;;  %v969_v15 = vld [vmem:[#allocation3 + $0x378] sm:$0xff]  ;;  %v968_v17 = vld [vmem:[#allocation3 + $0x370] sm:$0xff] }
 0x19b   :  { %v745_v28 = vsel %vm739_vm9, %v743_v26, %v744_v25  ;;  %v1024_v5 = vsel %vm1018_vm10, %v1022_v2, %v1023_v60  ;;  %v967_v18 = vld [vmem:[#allocation3 + $0x368] sm:$0xff]  ;;  %v966_v19 = vld [vmem:[#allocation3 + $0x360] sm:$0xff]  ;;  %v965_v20 = vld [vmem:[#allocation3 + $0x358] sm:$0xff] }
 0x19c   :  { %2615 = vmatprep.mubr.msk.f32.mxu1 %vm600_vm3, %v745_v28  ;;  %v3332_v31 = vld [vmem:[#allocation2 + $0x28] sm:$0xff]  ;;  %v964_v21 = vld [vmem:[#allocation3 + $0x350] sm:$0xff]  ;;  %v963_v22 = vld [vmem:[#allocation3 + $0x348] sm:$0xff] }
 0x19d   :  { %835 = vmatmul.mubr.f32.vlgmr.msra.gmra.mxu1 %v742_v30  ;;  %v748_v34 = vrot.slane %v3332_v31, 2  ;;  %2621 = vmatprep.mubr.msk.f32.mxu0 %vm600_vm3, %v3332_v31  ;;  %v962_v23 = vld [vmem:[#allocation3 + $0x340] sm:$0xff]  ;;  %v1013_v24 = vld [vmem:[#allocation3 + $0x4d8] sm:$0xff]  ;;  %v1011_v26 = vld [vmem:[#allocation3 + $0x4c8] sm:$0xff] }
 0x19e   :  { %1050 = vmatpush1.msra.mxu1 %v992_v29  ;;  %945 = vmatmul.mubr.f32.gmra.mxu0 %v3317_v16  ;;  %v1010_v27 = vld [vmem:[#allocation3 + $0x4c0] sm:$0xff]  ;;  %v1009_v28 = vld [vmem:[#allocation3 + $0x4b8] sm:$0xff]  ;;  %v1008_v29 = vld [vmem:[#allocation3 + $0x4b0] sm:$0xff] }
 0x19f   :  { %1051 = vmatprep.subr.mxu1 %v991_v33  ;;  %v749_v39 = vsel %vm739_vm9, %v744_v25, %v748_v34  ;;  %v1012_v25 = vld [vmem:[#allocation3 + $0x4d0] sm:$0xff]  ;;  %v1007_v30 = vld [vmem:[#allocation3 + $0x4a8] sm:$0xff]  ;;  %v1005_v33 = vld [vmem:[#allocation3 + $0x498] sm:$0xff] }
 0x1a0   :  { %1052 = vmatpush1.msra.mxu1 %v990_v36  ;;  %2616 = vmatprep.mubr.msk.f32.mxu1 %vm600_vm3, %v749_v39  ;;  %v3342_v41 = vld [vmem:[#allocation2 + $0x38] sm:$0xff]  ;;  %v1000_v39 = vld [vmem:[#allocation3 + $0x470] sm:$0xff] }
 0x1a1   :  { %1053 = vmatprep.subr.mxu1 %v989_v37  ;;  %841 = vmatmul.mubr.f32.gmra.mxu1 %v747_v40  ;;  %v752_v44 = vrot.slane %v3342_v41, 2  ;;  %v3345_v45 = vld [vmem:[#allocation2 + $0x30] sm:$0xff]  ;;  %v1003_v36 = vld [vmem:[#allocation3 + $0x488] sm:$0xff] }
 0x1a2   :  { %2622 = vmatprep.mubr.msk.f32.mxu0 %vm600_vm3, %v3342_v41  ;;  %1054 = vmatpush1.msra.mxu1 %v988_v35  ;;  %v750_v52 = vrot.slane %v3345_v45, 2  ;;  %v1002_v37 = vld [vmem:[#allocation3 + $0x480] sm:$0xff]  ;;  %v999_v35 = vld [vmem:[#allocation3 + $0x468] sm:$0xff]  ;;  %v1029_v59 = vrot.slane %v3345_v45, 4 }
 0x1a3   :  { %951 = vmatmul.mubr.f32.gmra.mxu0 %v3345_v45  ;;  %1055 = vmatprep.subr.mxu1 %v987_v43  ;;  %v753_v54 = vsel %vm739_vm9, %v748_v34, %v752_v44  ;;  %v757_v61 = vsel %vm739_vm9, %v752_v44, %v756_v47  ;;  %v1004_v34 = vld [vmem:[#allocation3 + $0x490] sm:$0xff]  ;;  %v998_v40 = vld [vmem:[#allocation3 + $0x460] sm:$0xff]  ;;  %v997_v44 = vld [vmem:[#allocation3 + $0x458] sm:$0xff] }
 0x1a4   :  { %1056 = vmatpush1.msra.mxu1 %v986_v48  ;;  %2617 = vmatprep.mubr.msk.f32.mxu1 %vm600_vm3, %v753_v54  ;;  %v751_v55 = vsel %vm739_vm9, %v746_v32, %v750_v52  ;;  %v755_v3 = vsel %vm739_vm9, %v750_v52, %v754_v57  ;;  %v1006_v32 = vld [vmem:[#allocation3 + $0x4a0] sm:$0xff]  ;;  %v957_v43 = vld [vmem:[#allocation2] sm:$0xf0]  ;;  %v995_v47 = vld [vmem:[#allocation3 + $0x448] sm:$0xff]  ;;  %v1027_v52 = vrot.slane %v3332_v31, 4  ;;  %v1020_v54 = vrot.slane %v3310_v6, 4 }
 0x1a5   :  { %1057 = vmatprep.subr.mxu1 %v985_v0  ;;  %847 = vmatmul.mubr.f32.gmra.mxu1 %v751_v55  ;;  %v996_v48 = vld [vmem:[#allocation3 + $0x450] sm:$0xff]  ;;  %v1019_v49 = vrot.slane %v957_v43, 4  ;;  %v994_v0 = vld [vmem:[#allocation3 + $0x440] sm:$0xff]  ;;  %v960_v31 = vld [vmem:[#allocation2 + $0x48] sm:$0xf] }
 0x1a6   :  { %1058 = vmatpush1.msra.mxu1 %v984_v51  ;;  %2618 = vmatprep.mubr.msk.f32.mxu1 %vm600_vm3, %v757_v61  ;;  %v1025_v51 = vrot.slane %v3317_v16, 4  ;;  %v1028_v57 = vsel %vm1018_vm10, %v1023_v60, %v1027_v52  ;;  %v1035_v61 = vrot.slane %v960_v31, 4  ;;  %v3379_v45 = vld [vmem:[#allocation2 + $0x40] sm:$0xff]  ;;  %v1273_v2 = vld [vmem:[#allocation8 + $0x78] sm:$0xff] }
 0x1a7   :  { %1059 = vmatprep.subr.mxu1 %v983_v56  ;;  %v1021_v55 = vsel %vm1018_vm10, %v1019_v49, %v1020_v54  ;;  %v1031_v56 = vrot.slane %v3342_v41, 4 }
 0x1a8   :  { %1060 = vmatpush1.msra.mxu1 %v982_v62  ;;  %v1026_v6 = vsel %vm1018_vm10, %v1020_v54, %v1025_v51  ;;  %v959_v62 = vld [vmem:[#allocation2 + $0x40] sm:$0xf]  ;;  %v1030_v41 = vsel %vm1018_vm10, %v1025_v51, %v1029_v59 }
 0x1a9   :  { %1061 = vmatprep.subr.mxu1 %v981_v63  ;;  %853 = vmatmul.mubr.f32.gmra.mxu1 %v755_v3  ;;  %v1032_v16 = vsel %vm1018_vm10, %v1027_v52, %v1031_v56  ;;  %v1033_v63 = vrot.slane %v959_v62, 4  ;;  %v1036_v58 = vsel %vm1018_vm10, %v1031_v56, %v1035_v61  ;;  %v1288_v3 = vld [vmem:[#allocation8 + $0xf0] sm:$0xff] }
 0x1aa   :  { %1062 = vmatpush1.msra.mxu1 %v980_v1  ;;  %2623 = vmatprep.mubr.msk.f32.mxu1 %vm600_vm3, %v1024_v5  ;;  %v1289_v1 = vld [vmem:[#allocation8 + $0xf8] sm:$0xf]  ;;  %v1287_v5 = vld [vmem:[#allocation8 + $0xe8] sm:$0xff] }
 0x1ab   :  { %1063 = vmatprep.subr.mxu1 %v979_v4  ;;  %v1034_v60 = vsel %vm1018_vm10, %v1029_v59, %v1033_v63  ;;  %2650 = vmatprep.subr.msk.mxu0 %vm1018_vm10, %v1289_v1  ;;  %v1272_v4 = vld [vmem:[#allocation8 + $0x70] sm:$0xff] }
 0x1ac   :  { %1064 = vmatpush1.msra.mxu1 %v978_v7  ;;  %2651 = vmatpush3.msra.mxu0 %v1273_v2  ;;  %v1271_v7 = vld [vmem:[#allocation8 + $0x68] sm:$0xff] }
 0x1ad   :  { %1065 = vmatprep.subr.mxu1 %v977_v8  ;;  %2652 = vmatprep.subr.mxu0 %v1288_v3  ;;  %v1286_v8 = vld [vmem:[#allocation8 + $0xe0] sm:$0xff] }
 0x1ae   :  { %1066 = vmatpush1.msra.mxu1 %v976_v9  ;;  %2653 = vmatpush3.msra.mxu0 %v1272_v4  ;;  %v1270_v9 = vld [vmem:[#allocation8 + $0x60] sm:$0xff] }
 0x1af   :  { %1067 = vmatprep.subr.mxu1 %v975_v10  ;;  %2654 = vmatprep.subr.mxu0 %v1287_v5  ;;  %v1285_v10 = vld [vmem:[#allocation8 + $0xd8] sm:$0xff] }
 0x1b0   :  { %1068 = vmatpush1.msra.mxu1 %v974_v11  ;;  %2655 = vmatpush3.msra.mxu0 %v1271_v7  ;;  %v1269_v11 = vld [vmem:[#allocation8 + $0x58] sm:$0xff] }
 0x1b1   :  { %1069 = vmatprep.subr.mxu1 %v973_v53  ;;  %2656 = vmatprep.subr.mxu0 %v1286_v8  ;;  %v1284_v53 = vld [vmem:[#allocation8 + $0xd0] sm:$0xff] }
 0x1b2   :  { %1070 = vmatpush1.msra.mxu1 %v972_v12  ;;  %2657 = vmatpush3.msra.mxu0 %v1270_v9  ;;  %v1268_v12 = vld [vmem:[#allocation8 + $0x50] sm:$0xff] }
 0x1b3   :  { %1071 = vmatprep.subr.mxu1 %v971_v13  ;;  %2658 = vmatprep.subr.mxu0 %v1285_v10  ;;  %v1283_v13 = vld [vmem:[#allocation8 + $0xc8] sm:$0xff] }
 0x1b4   :  { %1072 = vmatpush1.msra.mxu1 %v970_v14  ;;  %2659 = vmatpush3.msra.mxu0 %v1269_v11  ;;  %v1267_v14 = vld [vmem:[#allocation8 + $0x48] sm:$0xff] }
 0x1b5   :  { %1073 = vmatprep.subr.mxu1 %v969_v15  ;;  %2660 = vmatprep.subr.mxu0 %v1284_v53  ;;  %v1282_v15 = vld [vmem:[#allocation8 + $0xc0] sm:$0xff] }
 0x1b6   :  { %1074 = vmatpush1.msra.mxu1 %v968_v17  ;;  %2661 = vmatpush3.msra.mxu0 %v1268_v12  ;;  %v1266_v17 = vld [vmem:[#allocation8 + $0x40] sm:$0xff] }
 0x1b7   :  { %1075 = vmatprep.subr.mxu1 %v967_v18  ;;  %2662 = vmatprep.subr.mxu0 %v1283_v13  ;;  %v1281_v18 = vld [vmem:[#allocation8 + $0xb8] sm:$0xff] }
 0x1b8   :  { %1076 = vmatpush1.msra.mxu1 %v966_v19  ;;  %2663 = vmatpush3.msra.mxu0 %v1267_v14  ;;  %v1265_v19 = vld [vmem:[#allocation8 + $0x38] sm:$0xff] }
 0x1b9   :  { %1077 = vmatprep.subr.mxu1 %v965_v20  ;;  %2664 = vmatprep.subr.mxu0 %v1282_v15  ;;  %v1280_v20 = vld [vmem:[#allocation8 + $0xb0] sm:$0xff] }
 0x1ba   :  { %1078 = vmatpush1.msra.mxu1 %v964_v21  ;;  %2665 = vmatpush3.msra.mxu0 %v1266_v17  ;;  %v1264_v21 = vld [vmem:[#allocation8 + $0x30] sm:$0xff] }
 0x1bb   :  { %1079 = vmatprep.subr.mxu1 %v963_v22  ;;  %2666 = vmatprep.subr.mxu0 %v1281_v18  ;;  %v1279_v22 = vld [vmem:[#allocation8 + $0xa8] sm:$0xff] }
 0x1bc   :  { %1080 = vmatpush1.msra.mxu1 %v962_v23  ;;  %2667 = vmatpush3.msra.mxu0 %v1265_v19  ;;  %v1263_v23 = vld [vmem:[#allocation8 + $0x28] sm:$0xff] }
 0x1bd   :  { %1093 = vmatprep.subr.mxu1 %v1013_v24  ;;  %2668 = vmatprep.subr.mxu0 %v1280_v20  ;;  %v1278_v24 = vld [vmem:[#allocation8 + $0xa0] sm:$0xff] }
 0x1be   :  { %1094 = vmatpush2.msra.mxu1 %v1012_v25  ;;  %2669 = vmatpush3.msra.mxu0 %v1264_v21 }
 0x1bf   :  { %1095 = vmatprep.subr.mxu1 %v1011_v26  ;;  %2670 = vmatprep.subr.mxu0 %v1279_v22  ;;  %v1262_v26 = vld [vmem:[#allocation8 + $0x20] sm:$0xff] }
 0x1c0   :  { %1096 = vmatpush2.msra.mxu1 %v1010_v27  ;;  %2671 = vmatpush3.msra.mxu0 %v1263_v23  ;;  %v1277_v27 = vld [vmem:[#allocation8 + $0x98] sm:$0xff] }
 0x1c1   :  { %1097 = vmatprep.subr.mxu1 %v1009_v28  ;;  %2672 = vmatprep.subr.mxu0 %v1278_v24  ;;  %v1261_v28 = vld [vmem:[#allocation8 + $0x18] sm:$0xff] }
 0x1c2   :  { %1098 = vmatpush2.msra.mxu1 %v1008_v29  ;;  %2673 = vmatpush3.msra.mxu0 %v1262_v26  ;;  %v1276_v29 = vld [vmem:[#allocation8 + $0x90] sm:$0xff] }
 0x1c3   :  { %1099 = vmatprep.subr.mxu1 %v1007_v30  ;;  %2674 = vmatprep.subr.mxu0 %v1277_v27  ;;  %v1182_v27 = vld [vmem:[#allocation6] sm:$0x3] }
 0x1c4   :  { %1100 = vmatpush2.msra.mxu1 %v1006_v32  ;;  %v1260_v32 = vld [vmem:[#allocation8 + $0x10] sm:$0xff]  ;;  %2675 = vmatpush3.msra.mxu0 %v1261_v28 }
 0x1c5   :  { %1101 = vmatprep.subr.mxu1 %v1005_v33  ;;  %v1275_v33 = vld [vmem:[#allocation8 + $0x88] sm:$0xff]  ;;  %2676 = vmatprep.subr.mxu0 %v1276_v29  ;;  %v1369_v28 = vld [vmem:[#allocation6 + $0x2] sm:$0x3]  ;;  %v1555_v29 = vld [vmem:[#allocation6 + $0x4] sm:$0x3] }
 0x1c6   :  { %1102 = vmatpush2.msra.mxu1 %v1004_v34  ;;  %2677 = vmatpush3.msra.mxu0 %v1260_v32  ;;  %v1646_v32 = vld [vmem:[#allocation8 + $0x278] sm:$0xff] }
 0x1c7   :  { %1103 = vmatprep.subr.mxu1 %v1003_v36  ;;  %2678 = vmatprep.subr.mxu0 %v1275_v33  ;;  %v1661_v33 = vld [vmem:[#allocation8 + $0x2f0] sm:$0xff] }
 0x1c8   :  { %1104 = vmatpush2.msra.mxu1 %v1002_v37 }
 0x1c9   :  { %1105 = vmatprep.subr.mxu1 %v1001_v38 }
 0x1ca   :  { %1106 = vmatpush2.msra.mxu1 %v1000_v39 }
 0x1cb   :  { %1107 = vmatprep.subr.mxu1 %v999_v35 }
 0x1cc   :  { %1108 = vmatpush2.msra.mxu1 %v998_v40 }
 0x1cd   :  { %1109 = vmatprep.subr.mxu1 %v997_v44 }
 0x1ce   :  { %1110 = vmatpush2.msra.mxu1 %v996_v48 }
 0x1cf   :  { %1111 = vmatprep.subr.mxu1 %v995_v47 }
 0x1d0   :  { %1112 = vmatpush2.msra.mxu1 %v994_v0 }
 0x1d1   :  { %1114 = vmatmul.mubr.f32.vlgmr.msra.gmra.mxu1 %v1021_v55 }
 0x1d2   :  { %2624 = vmatprep.mubr.msk.f32.mxu1 %vm600_vm3, %v1028_v57 }
 0x1d5   :  { %1120 = vmatmul.mubr.f32.gmra.mxu1 %v1026_v6  ;;  %v1146_v6 = vld [vmem:[%s3575_s5] sm:$0x3] }
 0x1d6   :  { %2625 = vmatprep.mubr.msk.f32.mxu1 %vm600_vm3, %v1032_v16  ;;  %v1151_v2 = vrot.slane %v1146_v6, %v422_v46  ;;  %v1155_v7 = vrot.slane %v1146_v6, %v426_v50  ;;  %v1650_v6 = vld [vmem:[#allocation8 + $0x298] sm:$0xff] }
 0x1d9   :  { %1126 = vmatmul.mubr.f32.gmra.mxu1 %v1030_v41 }
 0x1da   :  { %2626 = vmatprep.mubr.msk.f32.mxu1 %vm600_vm3, %v1036_v58 }
 0x1dd   :  { %1132 = vmatmul.mubr.f32.gmra.mxu1 %v1034_v60 }
 0x1de   :  { %1251 = vmatprep.mubr.f32.mxu1 %v3379_v45 }
 0x255   :  { %v934_v37 = vpop.f32.mrf.mxu0 }
 0x257   :  { %v936_v39 = vpop.f32.mrf.mxu0 }
 0x25a   :  { %v940_v40 = vpop.f32.mrf.mxu0 }
 0x25c   :  { %v942_v44 = vpop.f32.mrf.mxu0 }
 0x25d   :  { %v836_v25 = vpop.f32.mrf.mxu1 }
 0x25e   :  { %v946_v47 = vpop.f32.mrf.mxu0  ;;  %v935_v10 = vadd.f32 %v934_v37, %v836_v25  ;;  %v1644_v37 = vld [vmem:[#allocation8 + $0x268] sm:$0xff] }
 0x25f   :  { %v838_v30 = vpop.f32.mrf.mxu1 }
 0x260   :  { %v948_v0 = vpop.f32.mrf.mxu0  ;;  %v937_v5 = vadd.f32 %v936_v39, %v838_v30  ;;  %v1662_v30 = vld [vmem:[#allocation8 + $0x2f8] sm:$0xf]  ;;  %v1643_v39 = vld [vmem:[#allocation8 + $0x260] sm:$0xff] }
 0x261   :  { %v842_v34 = vpop.f32.mrf.mxu1 }
 0x262   :  { %v941_v1 = vadd.f32 %v940_v40, %v842_v34  ;;  %v1645_v34 = vld [vmem:[#allocation8 + $0x270] sm:$0xff]  ;;  %v1642_v40 = vld [vmem:[#allocation8 + $0x258] sm:$0xff] }
 0x263   :  { %v844_v36 = vpop.f32.mrf.mxu1  ;;  %v952_v55 = vpop.f32.mrf.mxu0 }
 0x264   :  { %v943_v41 = vadd.f32 %v942_v44, %v844_v36  ;;  %v1660_v36 = vld [vmem:[#allocation8 + $0x2e8] sm:$0xff]  ;;  %v1641_v44 = vld [vmem:[#allocation8 + $0x250] sm:$0xff] }
 0x265   :  { %v848_v38 = vpop.f32.mrf.mxu1  ;;  %v954_v16 = vpop.f32.mrf.mxu0 }
 0x266   :  { %v947_v61 = vadd.f32 %v946_v47, %v848_v38  ;;  %v1659_v38 = vld [vmem:[#allocation8 + $0x2e0] sm:$0xff]  ;;  %v1640_v47 = vld [vmem:[#allocation8 + $0x248] sm:$0xff] }
 0x267   :  { %v850_v35 = vpop.f32.mrf.mxu1 }
 0x268   :  { %v949_v31 = vadd.f32 %v948_v0, %v850_v35  ;;  %v1658_v35 = vld [vmem:[#allocation8 + $0x2d8] sm:$0xff] }
 0x269   :  { %v854_v43 = vpop.f32.mrf.mxu1  ;;  %v1654_v0 = vld [vmem:[#allocation8 + $0x2b8] sm:$0xff] }
 0x26a   :  { %v953_v59 = vadd.f32 %v952_v55, %v854_v43  ;;  %v1657_v43 = vld [vmem:[#allocation8 + $0x2d0] sm:$0xff] }
 0x26b   :  { %v856_v48 = vpop.f32.mrf.mxu1  ;;  %v1637_v55 = vld [vmem:[#allocation8 + $0x230] sm:$0xff] }
 0x26c   :  { %v955_v63 = vadd.f32 %v954_v16, %v856_v48  ;;  %v1656_v48 = vld [vmem:[#allocation8 + $0x2c8] sm:$0xff]  ;;  %v1634_v16 = vld [vmem:[#allocation8 + $0x218] sm:$0xff] }
 0x291   :  { %v1115_v49 = vpop.f32.mrf.mxu1 }
 0x292   :  { %v1138_v15 = vadd.f32 %v1115_v49, %v935_v10  ;;  %v1655_v49 = vld [vmem:[#allocation8 + $0x2c0] sm:$0xff]  ;;  %v1459_v10 = vld [vmem:[#allocation8 + $0x170] sm:$0xff] }
 0x293   :  { %v1117_v52 = vpop.f32.mrf.mxu1 }
 0x294   :  { %v1139_v12 = vadd.f32 %v1117_v52, %v937_v5  ;;  %v1158_v42 = vadd.f32 %v1151_v2, %v1138_v15  ;;  %v1639_v52 = vld [vmem:[#allocation8 + $0x240] sm:$0xff]  ;;  %v1472_v15 = vld [vmem:[#allocation8 + $0x1d8] sm:$0xff] }
 0x295   :  { %v1121_v54 = vpop.f32.mrf.mxu1 }
 0x296   :  { %v1140_v11 = vadd.f32 %v1121_v54, %v941_v1  ;;  %v1159_v21 = vadd.f32 %v1155_v7, %v1139_v12  ;;  %v3409_v26 = vmax.f32 %v1158_v42, 0.0  ;;  %v1638_v54 = vld [vmem:[#allocation8 + $0x238] sm:$0xff]  ;;  %v1259_v1 = vld [vmem:[#allocation8 + $0x8] sm:$0xff]  ;;  %v1473_v12 = vld [vmem:[#allocation8 + $0x1e0] sm:$0xff] }
 0x297   :  { %v1123_v51 = vpop.f32.mrf.mxu1  ;;  %2679 = vmatpush3.msra.mxu0 %v1259_v1  ;;  %v1470_v42 = vld [vmem:[#allocation8 + $0x1c8] sm:$0xff] }
 0x298   :  { %v1141_v8 = vadd.f32 %v1123_v51, %v943_v41  ;;  %v1160_v46 = vadd.f32 %v1151_v2, %v1140_v11  ;;  %v3406_v25 = vmax.f32 %v1159_v21, 0.0  ;;  %v1653_v51 = vld [vmem:[#allocation8 + $0x2b0] sm:$0xff]  ;;  %v1648_v41 = vld [vmem:[#allocation8 + $0x288] sm:$0xff] }
 0x299   :  { %v1127_v56 = vpop.f32.mrf.mxu1  ;;  %v1474_v11 = vld [vmem:[#allocation8 + $0x1e8] sm:$0xff]  ;;  %v1455_v21 = vld [vmem:[#allocation8 + $0x150] sm:$0xff] }
 0x29a   :  { %v1142_v3 = vadd.f32 %v1127_v56, %v947_v61  ;;  %v1161_v18 = vadd.f32 %v1155_v7, %v1141_v8  ;;  %v3403_v24 = vmax.f32 %v1160_v46, 0.0  ;;  %v1652_v56 = vld [vmem:[#allocation8 + $0x2a8] sm:$0xff]  ;;  %v1649_v61 = vld [vmem:[#allocation8 + $0x290] sm:$0xff]  ;;  %v1460_v8 = vld [vmem:[#allocation8 + $0x178] sm:$0xff] }
 0x29b   :  { %v1129_v57 = vpop.f32.mrf.mxu1  ;;  %v1471_v46 = vld [vmem:[#allocation8 + $0x1d0] sm:$0xff]  ;;  %v2012_v1 = vld [vmem:[#allocation8 + $0x448] sm:$0xff] }
 0x29c   :  { %v1143_v58 = vadd.f32 %v1129_v57, %v949_v31  ;;  %v1162_v17 = vadd.f32 %v1151_v2, %v1142_v3  ;;  %v3400_v23 = vmax.f32 %v1161_v18, 0.0  ;;  %v1636_v57 = vld [vmem:[#allocation8 + $0x228] sm:$0xff]  ;;  %v1651_v31 = vld [vmem:[#allocation8 + $0x2a0] sm:$0xff] }
 0x29d   :  { %v1133_v62 = vpop.f32.mrf.mxu1  ;;  %v1258_v3 = vld [vmem:[#allocation8] sm:$0xff] }
 0x29e   :  { %v1144_v60 = vadd.f32 %v1133_v62, %v953_v59  ;;  %v1163_v13 = vadd.f32 %v1155_v7, %v1143_v58  ;;  %v3397_v50 = vmax.f32 %v1162_v17, 0.0  ;;  %v1635_v59 = vld [vmem:[#allocation8 + $0x220] sm:$0xff]  ;;  %v1633_v62 = vld [vmem:[#allocation8 + $0x210] sm:$0xff]  ;;  %v1456_v17 = vld [vmem:[#allocation8 + $0x158] sm:$0xff] }
 0x29f   :  { %v1135_v4 = vpop.f32.mrf.mxu1  ;;  %v1647_v58 = vld [vmem:[#allocation8 + $0x280] sm:$0xff] }
 0x2a0   :  { %v1145_v9 = vadd.f32 %v1135_v4, %v955_v63  ;;  %v1164_v53 = vadd.f32 %v1151_v2, %v1144_v60  ;;  %v3394_v22 = vmax.f32 %v1163_v13, 0.0  ;;  %v1632_v63 = vld [vmem:[#allocation8 + $0x208] sm:$0xff]  ;;  %v1631_v60 = vld [vmem:[#allocation8 + $0x200] sm:$0xff]  ;;  %v1476_v4 = vld [vmem:[#allocation8 + $0x1f8] sm:$0xf] }
 0x2a1   :  { %v1274_v2 = vld [vmem:[#allocation8 + $0x80] sm:$0xff] }
 0x2a2   :  { %v1165_v14 = vadd.f32 %v1155_v7, %v1145_v9  ;;  %v3392_v20 = vmax.f32 %v1164_v53, 0.0  ;;  %2680 = vmatprep.subr.mxu0 %v1274_v2  ;;  %v1475_v9 = vld [vmem:[#allocation8 + $0x1f0] sm:$0xff]  ;;  %v1458_v53 = vld [vmem:[#allocation8 + $0x168] sm:$0xff]  ;;  %v1457_v13 = vld [vmem:[#allocation8 + $0x160] sm:$0xff] }
 0x2a3   :  { %2681 = vmatpush3.msra.mxu0 %v1258_v3  ;;  %v2027_v2 = vld [vmem:[#allocation8 + $0x4c0] sm:$0xff] }
 0x2a4   :  { %v3390_v19 = vmax.f32 %v1165_v14, 0.0  ;;  %2685 = vmatprep.subr.msk.mxu0 %vm1018_vm10, %v1476_v4  ;;  %v2011_v3 = vld [vmem:[#allocation8 + $0x440] sm:$0xff]  ;;  %v1741_v4 = vld [vmem:[#allocation6 + $0x6] sm:$0x3] }
 0x2a6   :  { %1211 = vmatprep.subr.mxu1 %v3390_v19 }
 0x2a7   :  { %1212 = vmatpush1.msra.mxu1 %v3392_v20 }
 0x2a8   :  { %1213 = vmatprep.subr.mxu1 %v3394_v22 }
 0x2a9   :  { %1214 = vmatpush1.msra.mxu1 %v3397_v50 }
 0x2aa   :  { %1215 = vmatprep.subr.mxu1 %v3400_v23 }
 0x2ab   :  { %1216 = vmatpush1.msra.mxu1 %v3403_v24 }
 0x2ac   :  { %1217 = vmatprep.subr.mxu1 %v3406_v25 }
 0x2ad   :  { %1218 = vmatpush1.msra.mxu1 %v3409_v26 }
 0x2ae   :  { %2628 = vmatmul.mubr.msk.f32.vlgmr.msra.gmra.mxu1 %vm1183_vm11, %v1182_v27  ;;  %1397 = vmatprep.subr.mxu1 %v3390_v19  ;;  %v1454_v27 = vld [vmem:[#allocation8 + $0x148] sm:$0xff] }
 0x2af   :  { %1398 = vmatpush1.msra.mxu1 %v3392_v20  ;;  %1437 = vmatprep.mubr.f32.mxu1 %v3379_v45 }
 0x2b0   :  { %1399 = vmatprep.subr.mxu1 %v3394_v22 }
 0x2b1   :  { %1400 = vmatpush1.msra.mxu1 %v3397_v50 }
 0x2b2   :  { %1401 = vmatprep.subr.mxu1 %v3400_v23 }
 0x2b3   :  { %1402 = vmatpush1.msra.mxu1 %v3403_v24 }
 0x2b4   :  { %1403 = vmatprep.subr.mxu1 %v3406_v25 }
 0x2b5   :  { %1404 = vmatpush1.msra.mxu1 %v3409_v26 }
 0x2b6   :  { %1583 = vmatprep.subr.mxu1 %v3390_v19  ;;  %2631 = vmatmul.mubr.msk.f32.vlgmr.msra.gmra.mxu1 %vm1183_vm11, %v1369_v28  ;;  %v1469_v28 = vld [vmem:[#allocation8 + $0x1c0] sm:$0xff] }
 0x2b7   :  { %1584 = vmatpush1.msra.mxu1 %v3392_v20  ;;  %1623 = vmatprep.mubr.f32.mxu1 %v3379_v45 }
 0x2b8   :  { %1585 = vmatprep.subr.mxu1 %v3394_v22 }
 0x2b9   :  { %1586 = vmatpush1.msra.mxu1 %v3397_v50 }
 0x2ba   :  { %1587 = vmatprep.subr.mxu1 %v3400_v23 }
 0x2bb   :  { %1588 = vmatpush1.msra.mxu1 %v3403_v24 }
 0x2bc   :  { %1589 = vmatprep.subr.mxu1 %v3406_v25 }
 0x2bd   :  { %1590 = vmatpush1.msra.mxu1 %v3409_v26 }
 0x2be   :  { %2634 = vmatmul.mubr.msk.f32.vlgmr.msra.gmra.mxu1 %vm1183_vm11, %v1555_v29  ;;  %2720 = vmatprep.subr.msk.mxu1 %vm1018_vm10, %v1662_v30  ;;  %v1453_v30 = vld [vmem:[#allocation8 + $0x140] sm:$0xff] }
 0x2bf   :  { %2721 = vmatpush3.msra.mxu1 %v1646_v32  ;;  %v1468_v32 = vld [vmem:[#allocation8 + $0x1b8] sm:$0xff] }
 0x2c0   :  { %2722 = vmatprep.subr.mxu1 %v1661_v33 }
 0x2c1   :  { %2723 = vmatpush3.msra.mxu1 %v1645_v34  ;;  %v1452_v34 = vld [vmem:[#allocation8 + $0x138] sm:$0xff] }
 0x2c2   :  { %2724 = vmatprep.subr.mxu1 %v1660_v36  ;;  %v1467_v36 = vld [vmem:[#allocation8 + $0x1b0] sm:$0xff] }
 0x2c3   :  { %2725 = vmatpush3.msra.mxu1 %v1644_v37  ;;  %v1451_v37 = vld [vmem:[#allocation8 + $0x130] sm:$0xff] }
 0x2c4   :  { %2726 = vmatprep.subr.mxu1 %v1659_v38  ;;  %v1466_v38 = vld [vmem:[#allocation8 + $0x1a8] sm:$0xff] }
 0x2c5   :  { %2727 = vmatpush3.msra.mxu1 %v1643_v39  ;;  %v1450_v39 = vld [vmem:[#allocation8 + $0x128] sm:$0xff] }
 0x2c6   :  { %2728 = vmatprep.subr.mxu1 %v1658_v35  ;;  %v1465_v35 = vld [vmem:[#allocation8 + $0x1a0] sm:$0xff] }
 0x2c7   :  { %2729 = vmatpush3.msra.mxu1 %v1642_v40  ;;  %v1449_v40 = vld [vmem:[#allocation8 + $0x120] sm:$0xff] }
 0x2c8   :  { %2730 = vmatprep.subr.mxu1 %v1657_v43  ;;  %v1464_v43 = vld [vmem:[#allocation8 + $0x198] sm:$0xff] }
 0x2c9   :  { %2731 = vmatpush3.msra.mxu1 %v1641_v44  ;;  %v1927_v44 = vld [vmem:[#allocation6 + $0x8] sm:$0x3] }
 0x2ca   :  { %2732 = vmatprep.subr.mxu1 %v1656_v48  ;;  %v2034_v48 = vld [vmem:[#allocation8 + $0x4f8] sm:$0xf] }
 0x2cb   :  { %2733 = vmatpush3.msra.mxu1 %v1640_v47  ;;  %v1448_v47 = vld [vmem:[#allocation8 + $0x118] sm:$0xff] }
 0x2cc   :  { %2734 = vmatprep.subr.mxu1 %v1655_v49  ;;  %v2018_v49 = vld [vmem:[#allocation8 + $0x478] sm:$0xff] }
 0x2cd   :  { %2735 = vmatpush3.msra.mxu1 %v1639_v52  ;;  %v1463_v52 = vld [vmem:[#allocation8 + $0x190] sm:$0xff] }
 0x2ce   :  { %2736 = vmatprep.subr.mxu1 %v1654_v0  ;;  %v2033_v0 = vld [vmem:[#allocation8 + $0x4f0] sm:$0xff] }
 0x2cf   :  { %2737 = vmatpush3.msra.mxu1 %v1638_v54  ;;  %v1447_v54 = vld [vmem:[#allocation8 + $0x110] sm:$0xff] }
 0x2d0   :  { %2738 = vmatprep.subr.mxu1 %v1653_v51  ;;  %v2017_v51 = vld [vmem:[#allocation8 + $0x470] sm:$0xff] }
 0x2d1   :  { %2739 = vmatpush3.msra.mxu1 %v1637_v55  ;;  %v1462_v55 = vld [vmem:[#allocation8 + $0x188] sm:$0xff] }
 0x2d2   :  { %2740 = vmatprep.subr.mxu1 %v1652_v56  ;;  %v2032_v56 = vld [vmem:[#allocation8 + $0x4e8] sm:$0xff] }
 0x2d3   :  { %2741 = vmatpush3.msra.mxu1 %v1636_v57  ;;  %v1446_v57 = vld [vmem:[#allocation8 + $0x108] sm:$0xff] }
 0x2d4   :  { %2742 = vmatprep.subr.mxu1 %v1651_v31  ;;  %v2016_v31 = vld [vmem:[#allocation8 + $0x468] sm:$0xff] }
 0x2d5   :  { %2743 = vmatpush3.msra.mxu1 %v1635_v59  ;;  %v1461_v59 = vld [vmem:[#allocation8 + $0x180] sm:$0xff] }
 0x2d6   :  { %2744 = vmatprep.subr.mxu1 %v1650_v6  ;;  %v2031_v6 = vld [vmem:[#allocation8 + $0x4e0] sm:$0xff] }
 0x2d7   :  { %2745 = vmatpush3.msra.mxu1 %v1634_v16  ;;  %v1445_v16 = vld [vmem:[#allocation8 + $0x100] sm:$0xff] }
 0x2d8   :  { %2746 = vmatprep.subr.mxu1 %v1649_v61  ;;  %v2015_v61 = vld [vmem:[#allocation8 + $0x460] sm:$0xff] }
 0x2d9   :  { %2747 = vmatpush3.msra.mxu1 %v1633_v62  ;;  %v2030_v62 = vld [vmem:[#allocation8 + $0x4d8] sm:$0xff] }
 0x2da   :  { %2748 = vmatprep.subr.mxu1 %v1648_v41  ;;  %v2014_v41 = vld [vmem:[#allocation8 + $0x458] sm:$0xff] }
 0x2db   :  { %2749 = vmatpush3.msra.mxu1 %v1632_v63  ;;  %v2029_v63 = vld [vmem:[#allocation8 + $0x4d0] sm:$0xff] }
 0x2dc   :  { %2750 = vmatprep.subr.mxu1 %v1647_v58  ;;  %v2013_v58 = vld [vmem:[#allocation8 + $0x450] sm:$0xff] }
 0x2dd   :  { %2751 = vmatpush3.msra.mxu1 %v1631_v60  ;;  %v2028_v60 = vld [vmem:[#allocation8 + $0x4c8] sm:$0xff] }
 0x2de   :  { %1955 = vmatprep.subr.mxu1 %v3390_v19 }
 0x36e   :  { %v1253_v5 = vpop.f32.mrf.mxu1 }
 0x370   :  { %v1255_v7 = vpop.f32.mrf.mxu1 }
 0x371   :  { %2630 = vmatprep.mubr.msk.f32.mxu0 %vm1290_vm12, %v1255_v7  ;;  %v2026_v7 = vld [vmem:[#allocation8 + $0x4b8] sm:$0xff] }
 0x372   :  { %1362 = vmatmul.mubr.f32.vlgmr.msra.gmra.mxu0 %v1253_v5  ;;  %v1848_v5 = vld [vmem:[#allocation8 + $0x3f8] sm:$0xf] }
 0x373   :  { %2686 = vmatpush3.msra.mxu0 %v1460_v8  ;;  %v1832_v8 = vld [vmem:[#allocation8 + $0x378] sm:$0xff] }
 0x374   :  { %2687 = vmatprep.subr.mxu0 %v1475_v9  ;;  %v2010_v9 = vld [vmem:[#allocation8 + $0x438] sm:$0xff] }
 0x375   :  { %2688 = vmatpush3.msra.mxu0 %v1459_v10  ;;  %v1847_v10 = vld [vmem:[#allocation8 + $0x3f0] sm:$0xff] }
 0x376   :  { %2689 = vmatprep.subr.mxu0 %v1474_v11  ;;  %v3439_v14 = vpop.f32.mrf.mxu1  ;;  %v2025_v11 = vld [vmem:[#allocation8 + $0x4b0] sm:$0xff] }
 0x377   :  { %2690 = vmatpush3.msra.mxu0 %v1458_v53  ;;  %v1831_v53 = vld [vmem:[#allocation8 + $0x370] sm:$0xff] }
 0x378   :  { %2691 = vmatprep.subr.mxu0 %v1473_v12  ;;  %v1441_v18 = vpop.f32.mrf.mxu1  ;;  %v2009_v12 = vld [vmem:[#allocation8 + $0x430] sm:$0xff] }
 0x379   :  { %2692 = vmatpush3.msra.mxu0 %v1457_v13  ;;  %2633 = vmatprep.mubr.msk.f32.mxu0 %vm1290_vm12, %v1441_v18  ;;  %v1846_v13 = vld [vmem:[#allocation8 + $0x3e8] sm:$0xff]  ;;  %v1845_v18 = vld [vmem:[#allocation8 + $0x3e0] sm:$0xff] }
 0x37a   :  { %2693 = vmatprep.subr.mxu0 %v1472_v15  ;;  %v1830_v15 = vld [vmem:[#allocation8 + $0x368] sm:$0xff] }
 0x37b   :  { %2694 = vmatpush3.msra.mxu0 %v1456_v17  ;;  %v2008_v17 = vld [vmem:[#allocation8 + $0x428] sm:$0xff] }
 0x37c   :  { %2695 = vmatprep.subr.mxu0 %v1471_v46  ;;  %v2023_v46 = vld [vmem:[#allocation8 + $0x4a0] sm:$0xff] }
 0x37d   :  { %2696 = vmatpush3.msra.mxu0 %v1455_v21  ;;  %v1829_v21 = vld [vmem:[#allocation8 + $0x360] sm:$0xff] }
 0x37e   :  { %2697 = vmatprep.subr.mxu0 %v1470_v42  ;;  %v1625_v29 = vpop.f32.mrf.mxu1  ;;  %v2007_v42 = vld [vmem:[#allocation8 + $0x420] sm:$0xff] }
 0x37f   :  { %2698 = vmatpush3.msra.mxu0 %v1454_v27  ;;  %v1844_v27 = vld [vmem:[#allocation8 + $0x3d8] sm:$0xff] }
 0x380   :  { %2699 = vmatprep.subr.mxu0 %v1469_v28  ;;  %v1627_v33 = vpop.f32.mrf.mxu1  ;;  %v2022_v28 = vld [vmem:[#allocation8 + $0x498] sm:$0xff] }
 0x381   :  { %2700 = vmatpush3.msra.mxu0 %v1453_v30  ;;  %2636 = vmatprep.mubr.msk.f32.mxu1 %vm1290_vm12, %v1627_v33  ;;  %v2006_v30 = vld [vmem:[#allocation8 + $0x418] sm:$0xff]  ;;  %v2021_v33 = vld [vmem:[#allocation8 + $0x490] sm:$0xff] }
 0x382   :  { %2701 = vmatprep.subr.mxu0 %v1468_v32  ;;  %1734 = vmatmul.mubr.f32.vlgmr.msra.gmra.mxu1 %v1625_v29  ;;  %v1828_v29 = vld [vmem:[#allocation8 + $0x358] sm:$0xff]  ;;  %v1843_v32 = vld [vmem:[#allocation8 + $0x3d0] sm:$0xff] }
 0x383   :  { %2702 = vmatpush3.msra.mxu0 %v1452_v34  ;;  %1956 = vmatpush1.msra.mxu1 %v3392_v20  ;;  %v1827_v34 = vld [vmem:[#allocation8 + $0x350] sm:$0xff] }
 0x384   :  { %2703 = vmatprep.subr.mxu0 %v1467_v36  ;;  %1957 = vmatprep.subr.mxu1 %v3394_v22  ;;  %v2005_v36 = vld [vmem:[#allocation8 + $0x410] sm:$0xff] }
 0x385   :  { %2704 = vmatpush3.msra.mxu0 %v1451_v37  ;;  %1958 = vmatpush1.msra.mxu1 %v3397_v50  ;;  %v1842_v37 = vld [vmem:[#allocation8 + $0x3c8] sm:$0xff] }
 0x386   :  { %2705 = vmatprep.subr.mxu0 %v1466_v38  ;;  %1959 = vmatprep.subr.mxu1 %v3400_v23  ;;  %v2020_v38 = vld [vmem:[#allocation8 + $0x488] sm:$0xff] }
 0x387   :  { %2706 = vmatpush3.msra.mxu0 %v1450_v39  ;;  %1960 = vmatpush1.msra.mxu1 %v3403_v24  ;;  %v1826_v39 = vld [vmem:[#allocation8 + $0x348] sm:$0xff] }
 0x388   :  { %2707 = vmatprep.subr.mxu0 %v1465_v35  ;;  %1961 = vmatprep.subr.mxu1 %v3406_v25  ;;  %v2004_v35 = vld [vmem:[#allocation8 + $0x408] sm:$0xff] }
 0x389   :  { %2708 = vmatpush3.msra.mxu0 %v1449_v40  ;;  %1962 = vmatpush1.msra.mxu1 %v3409_v26  ;;  %v1841_v40 = vld [vmem:[#allocation8 + $0x3c0] sm:$0xff] }
 0x38a   :  { %1995 = vmatprep.mubr.f32.mxu1 %v3379_v45  ;;  %2709 = vmatprep.subr.mxu0 %v1464_v43  ;;  %v2019_v43 = vld [vmem:[#allocation8 + $0x480] sm:$0xff] }
 0x38b   :  { %2640 = vmatmul.mubr.msk.f32.vlgmr.msra.gmra.mxu1 %vm1183_vm11, %v1927_v44  ;;  %2790 = vmatprep.subr.msk.mxu1 %vm1018_vm10, %v2034_v48  ;;  %v1825_v44 = vld [vmem:[#allocation8 + $0x340] sm:$0xff] }
 0x38c   :  { %2710 = vmatpush3.msra.mxu0 %v1448_v47  ;;  %2791 = vmatpush3.msra.mxu1 %v2018_v49  ;;  %v2003_v48 = vld [vmem:[#allocation8 + $0x400] sm:$0xff]  ;;  %v1840_v47 = vld [vmem:[#allocation8 + $0x3b8] sm:$0xff] }
 0x38d   :  { %2711 = vmatprep.subr.mxu0 %v1463_v52  ;;  %2792 = vmatprep.subr.mxu1 %v2033_v0  ;;  %v1824_v49 = vld [vmem:[#allocation8 + $0x338] sm:$0xff]  ;;  %v1839_v52 = vld [vmem:[#allocation8 + $0x3b0] sm:$0xff] }
 0x38e   :  { %2712 = vmatpush3.msra.mxu0 %v1447_v54  ;;  %2793 = vmatpush3.msra.mxu1 %v2017_v51  ;;  %v1823_v0 = vld [vmem:[#allocation8 + $0x330] sm:$0xff]  ;;  %v1838_v54 = vld [vmem:[#allocation8 + $0x3a8] sm:$0xff] }
 0x38f   :  { %2713 = vmatprep.subr.mxu0 %v1462_v55  ;;  %2794 = vmatprep.subr.mxu1 %v2032_v56  ;;  %v1822_v51 = vld [vmem:[#allocation8 + $0x328] sm:$0xff]  ;;  %v1837_v55 = vld [vmem:[#allocation8 + $0x3a0] sm:$0xff] }
 0x390   :  { %2714 = vmatpush3.msra.mxu0 %v1446_v57  ;;  %2795 = vmatpush3.msra.mxu1 %v2016_v31  ;;  %v1821_v56 = vld [vmem:[#allocation8 + $0x320] sm:$0xff]  ;;  %v1836_v57 = vld [vmem:[#allocation8 + $0x398] sm:$0xff] }
 0x391   :  { %2715 = vmatprep.subr.mxu0 %v1461_v59  ;;  %2796 = vmatprep.subr.mxu1 %v2031_v6  ;;  %v1820_v31 = vld [vmem:[#allocation8 + $0x318] sm:$0xff]  ;;  %v1835_v59 = vld [vmem:[#allocation8 + $0x390] sm:$0xff] }
 0x392   :  { %2716 = vmatpush3.msra.mxu0 %v1445_v16  ;;  %2797 = vmatpush3.msra.mxu1 %v2015_v61  ;;  %v1819_v6 = vld [vmem:[#allocation8 + $0x310] sm:$0xff]  ;;  %v1834_v16 = vld [vmem:[#allocation8 + $0x388] sm:$0xff] }
 0x393   :  { %1548 = vmatmul.mubr.f32.vlgmr.msra.gmra.mxu0 %v3439_v14  ;;  %1769 = vmatprep.subr.mxu0 %v3390_v19  ;;  %v2024_v14 = vld [vmem:[#allocation8 + $0x4a8] sm:$0xff] }
 0x394   :  { %2798 = vmatprep.subr.mxu1 %v2030_v62  ;;  %1770 = vmatpush1.msra.mxu0 %v3392_v20  ;;  %v1818_v61 = vld [vmem:[#allocation8 + $0x308] sm:$0xff]  ;;  %v1833_v62 = vld [vmem:[#allocation8 + $0x380] sm:$0xff] }
 0x395   :  { %2799 = vmatpush3.msra.mxu1 %v2014_v41  ;;  %1771 = vmatprep.subr.mxu0 %v3394_v22  ;;  %v1817_v41 = vld [vmem:[#allocation8 + $0x300] sm:$0xff] }
 0x396   :  { %2800 = vmatprep.subr.mxu1 %v2029_v63  ;;  %1772 = vmatpush1.msra.mxu0 %v3397_v50 }
 0x397   :  { %2801 = vmatpush3.msra.mxu1 %v2013_v58  ;;  %1773 = vmatprep.subr.mxu0 %v3400_v23 }
 0x398   :  { %2802 = vmatprep.subr.mxu1 %v2028_v60  ;;  %1774 = vmatpush1.msra.mxu0 %v3403_v24 }
 0x399   :  { %2803 = vmatpush3.msra.mxu1 %v2012_v1  ;;  %1775 = vmatprep.subr.mxu0 %v3406_v25 }
 0x39a   :  { %2804 = vmatprep.subr.mxu1 %v2027_v2  ;;  %1776 = vmatpush1.msra.mxu0 %v3409_v26 }
 0x39b   :  { %1809 = vmatprep.mubr.f32.mxu0 %v3379_v45  ;;  %2805 = vmatpush3.msra.mxu1 %v2011_v3 }
 0x39c   :  { %2637 = vmatmul.mubr.msk.f32.vlgmr.msra.gmra.mxu0 %vm1183_vm11, %v1741_v4  ;;  %2755 = vmatprep.subr.msk.mxu0 %vm1018_vm10, %v1848_v5 }
 0x39d   :  { %2806 = vmatprep.subr.mxu1 %v2026_v7  ;;  %2756 = vmatpush3.msra.mxu0 %v1832_v8  ;;  %v2299_v8 = vld [vmem:[#allocation6 + $0xc] sm:$0x3] }
 0x39e   :  { %2807 = vmatpush3.msra.mxu1 %v2010_v9  ;;  %2757 = vmatprep.subr.mxu0 %v1847_v10  ;;  %v2406_v9 = vld [vmem:[#allocation8 + $0x6f8] sm:$0xf] }
 0x39f   :  { %2808 = vmatprep.subr.mxu1 %v2025_v11  ;;  %2758 = vmatpush3.msra.mxu0 %v1831_v53  ;;  %v2390_v11 = vld [vmem:[#allocation8 + $0x678] sm:$0xff] }
 0x3a0   :  { %2809 = vmatpush3.msra.mxu1 %v2009_v12  ;;  %2759 = vmatprep.subr.mxu0 %v1846_v13  ;;  %v2405_v13 = vld [vmem:[#allocation8 + $0x6f0] sm:$0xff] }
 0x3a1   :  { %2810 = vmatprep.subr.mxu1 %v2024_v14  ;;  %2760 = vmatpush3.msra.mxu0 %v1830_v15  ;;  %v2389_v14 = vld [vmem:[#allocation8 + $0x670] sm:$0xff] }
 0x3a2   :  { %2811 = vmatpush3.msra.mxu1 %v2008_v17  ;;  %2761 = vmatprep.subr.mxu0 %v1845_v18  ;;  %v2404_v17 = vld [vmem:[#allocation8 + $0x6e8] sm:$0xff] }
 0x3a3   :  { %2812 = vmatprep.subr.mxu1 %v2023_v46  ;;  %2762 = vmatpush3.msra.mxu0 %v1829_v21  ;;  %v2388_v18 = vld [vmem:[#allocation8 + $0x668] sm:$0xff]  ;;  %v2403_v46 = vld [vmem:[#allocation8 + $0x6e0] sm:$0xff] }
 0x3a4   :  { %2813 = vmatpush3.msra.mxu1 %v2007_v42  ;;  %2763 = vmatprep.subr.mxu0 %v1844_v27  ;;  %v2387_v42 = vld [vmem:[#allocation8 + $0x660] sm:$0xff] }
 0x3a5   :  { %2814 = vmatprep.subr.mxu1 %v2022_v28  ;;  %2764 = vmatpush3.msra.mxu0 %v1828_v29  ;;  %v2402_v28 = vld [vmem:[#allocation8 + $0x6d8] sm:$0xff] }
 0x3a6   :  { %2815 = vmatpush3.msra.mxu1 %v2006_v30  ;;  %2765 = vmatprep.subr.mxu0 %v1843_v32  ;;  %v2386_v29 = vld [vmem:[#allocation8 + $0x658] sm:$0xff]  ;;  %v2401_v32 = vld [vmem:[#allocation8 + $0x6d0] sm:$0xff] }
 0x3a7   :  { %2816 = vmatprep.subr.mxu1 %v2021_v33  ;;  %2766 = vmatpush3.msra.mxu0 %v1827_v34  ;;  %v2385_v33 = vld [vmem:[#allocation8 + $0x650] sm:$0xff]  ;;  %v2400_v34 = vld [vmem:[#allocation8 + $0x6c8] sm:$0xff] }
 0x3a8   :  { %2817 = vmatpush3.msra.mxu1 %v2005_v36  ;;  %2767 = vmatprep.subr.mxu0 %v1842_v37  ;;  %v2384_v36 = vld [vmem:[#allocation8 + $0x648] sm:$0xff]  ;;  %v2399_v37 = vld [vmem:[#allocation8 + $0x6c0] sm:$0xff] }
 0x3a9   :  { %2818 = vmatprep.subr.mxu1 %v2020_v38  ;;  %2768 = vmatpush3.msra.mxu0 %v1826_v39  ;;  %v2383_v38 = vld [vmem:[#allocation8 + $0x640] sm:$0xff]  ;;  %v2113_v39 = vld [vmem:[#allocation6 + $0xa] sm:$0x3] }
 0x3aa   :  { %2819 = vmatpush3.msra.mxu1 %v2004_v35  ;;  %2769 = vmatprep.subr.mxu0 %v1841_v40  ;;  %v2220_v35 = vld [vmem:[#allocation8 + $0x5f8] sm:$0xf]  ;;  %v2397_v40 = vld [vmem:[#allocation8 + $0x6b0] sm:$0xff] }
 0x3ab   :  { %2820 = vmatprep.subr.mxu1 %v2019_v43  ;;  %2770 = vmatpush3.msra.mxu0 %v1825_v44  ;;  %v2202_v43 = vld [vmem:[#allocation8 + $0x568] sm:$0xff]  ;;  %v2216_v44 = vld [vmem:[#allocation8 + $0x5d8] sm:$0xff] }
 0x3ac   :  { %2821 = vmatpush3.msra.mxu1 %v2003_v48  ;;  %2771 = vmatprep.subr.mxu0 %v1840_v47  ;;  %v2200_v48 = vld [vmem:[#allocation8 + $0x558] sm:$0xff]  ;;  %v2215_v47 = vld [vmem:[#allocation8 + $0x5d0] sm:$0xff] }
 0x3ad   :  { %2327 = vmatprep.subr.mxu1 %v3390_v19  ;;  %2772 = vmatpush3.msra.mxu0 %v1824_v49  ;;  %v2199_v49 = vld [vmem:[#allocation8 + $0x550] sm:$0xff] }
 0x3ae   :  { %2773 = vmatprep.subr.mxu0 %v1839_v52  ;;  %v2214_v52 = vld [vmem:[#allocation8 + $0x5c8] sm:$0xff] }
 0x3af   :  { %2774 = vmatpush3.msra.mxu0 %v1823_v0  ;;  %v2198_v0 = vld [vmem:[#allocation8 + $0x548] sm:$0xff] }
 0x3b0   :  { %2775 = vmatprep.subr.mxu0 %v1838_v54  ;;  %v2213_v54 = vld [vmem:[#allocation8 + $0x5c0] sm:$0xff] }
 0x3b1   :  { %2776 = vmatpush3.msra.mxu0 %v1822_v51  ;;  %v2197_v51 = vld [vmem:[#allocation8 + $0x540] sm:$0xff] }
 0x3b2   :  { %2777 = vmatprep.subr.mxu0 %v1837_v55  ;;  %v2212_v55 = vld [vmem:[#allocation8 + $0x5b8] sm:$0xff] }
 0x3b3   :  { %2778 = vmatpush3.msra.mxu0 %v1821_v56  ;;  %v2196_v56 = vld [vmem:[#allocation8 + $0x538] sm:$0xff] }
 0x3b4   :  { %2779 = vmatprep.subr.mxu0 %v1836_v57  ;;  %v2211_v57 = vld [vmem:[#allocation8 + $0x5b0] sm:$0xff] }
 0x3b5   :  { %2780 = vmatpush3.msra.mxu0 %v1820_v31  ;;  %v2195_v31 = vld [vmem:[#allocation8 + $0x530] sm:$0xff] }
 0x3b6   :  { %2781 = vmatprep.subr.mxu0 %v1835_v59  ;;  %v2210_v59 = vld [vmem:[#allocation8 + $0x5a8] sm:$0xff] }
 0x3b7   :  { %2782 = vmatpush3.msra.mxu0 %v1819_v6  ;;  %v2381_v6 = vld [vmem:[#allocation8 + $0x630] sm:$0xff] }
 0x3b8   :  { %2783 = vmatprep.subr.mxu0 %v1834_v16  ;;  %v2396_v16 = vld [vmem:[#allocation8 + $0x6a8] sm:$0xff] }
 0x3b9   :  { %2784 = vmatpush3.msra.mxu0 %v1818_v61  ;;  %v2380_v61 = vld [vmem:[#allocation8 + $0x628] sm:$0xff] }
 0x3ba   :  { %2785 = vmatprep.subr.mxu0 %v1833_v62  ;;  %v2395_v62 = vld [vmem:[#allocation8 + $0x6a0] sm:$0xff] }
 0x3bb   :  { %2786 = vmatpush3.msra.mxu0 %v1817_v41  ;;  %v2379_v41 = vld [vmem:[#allocation8 + $0x620] sm:$0xff] }
 0x3bc   :  { %2141 = vmatprep.subr.mxu0 %v3390_v19  ;;  %v2627_v19 = vld [vmem:[%s3578_s8] ss:$0 sm:$0xff] }
 0x432   :  { %v2682_v63 = vpop.f32.mrf.mxu0 }
 0x434   :  { %v2683_v58 = vpop.f32.mrf.mxu0 }
 0x435   :  { %v2684_v60 = vadd.f32 %v2683_v58, %v2682_v63  ;;  %v2194_v63 = vld [vmem:[#allocation8 + $0x528] sm:$0xff]  ;;  %v2209_v58 = vld [vmem:[#allocation8 + $0x5a0] sm:$0xff] }
 0x437   :  { %v1367_v53 = vadd.f32 %v2684_v60, %v2627_v19  ;;  %v2394_v60 = vld [vmem:[#allocation8 + $0x698] sm:$0xff] }
 0x438   :  { %v2192_v19 = vld [vmem:[#allocation8 + $0x518] sm:$0xff] }
 0x442   :  { %v2752_v1 = vpop.f32.mrf.mxu1 }
 0x444   :  { %v2753_v2 = vpop.f32.mrf.mxu1 }
 0x445   :  { %v2754_v3 = vadd.f32 %v2753_v2, %v2752_v1  ;;  %v2378_v1 = vld [vmem:[#allocation8 + $0x618] sm:$0xff]  ;;  %v2193_v2 = vld [vmem:[#allocation8 + $0x520] sm:$0xff] }
 0x44b   :  { %v1997_v4 = vpop.f32.mrf.mxu1 }
 0x44d   :  { %v1999_v5 = vpop.f32.mrf.mxu1 }
 0x44e   :  { %2642 = vmatprep.mubr.msk.f32.mxu1 %vm1290_vm12, %v1999_v5  ;;  %v2377_v5 = vld [vmem:[#allocation8 + $0x610] sm:$0xff] }
 0x44f   :  { %2106 = vmatmul.mubr.f32.vlgmr.msra.gmra.mxu1 %v1997_v4  ;;  %v2208_v4 = vld [vmem:[#allocation8 + $0x598] sm:$0xff] }
 0x450   :  { %2328 = vmatpush1.msra.mxu1 %v3392_v20  ;;  %2367 = vmatprep.mubr.f32.mxu1 %v3379_v45 }
 0x451   :  { %2329 = vmatprep.subr.mxu1 %v3394_v22 }
 0x452   :  { %2330 = vmatpush1.msra.mxu1 %v3397_v50 }
 0x453   :  { %2331 = vmatprep.subr.mxu1 %v3400_v23  ;;  %v2717_v7 = vpop.f32.mrf.mxu0 }
 0x454   :  { %2332 = vmatpush1.msra.mxu1 %v3403_v24 }
 0x455   :  { %2333 = vmatprep.subr.mxu1 %v3406_v25  ;;  %v2718_v10 = vpop.f32.mrf.mxu0 }
 0x456   :  { %v2719_v12 = vadd.f32 %v2718_v10, %v2717_v7  ;;  %2334 = vmatpush1.msra.mxu1 %v3409_v26  ;;  %v2392_v7 = vld [vmem:[#allocation8 + $0x688] sm:$0xff]  ;;  %v2191_v10 = vld [vmem:[#allocation8 + $0x510] sm:$0xff] }
 0x457   :  { %2646 = vmatmul.mubr.msk.f32.vlgmr.msra.gmra.mxu1 %vm1183_vm11, %v2299_v8  ;;  %2860 = vmatprep.subr.msk.mxu1 %vm1018_vm10, %v2406_v9  ;;  %v2207_v8 = vld [vmem:[#allocation8 + $0x590] sm:$0xff]  ;;  %v2376_v9 = vld [vmem:[#allocation8 + $0x608] sm:$0xff] }
 0x458   :  { %v1553_v15 = vadd.f32 %v2719_v12, %v1367_v53  ;;  %2861 = vmatpush3.msra.mxu1 %v2390_v11  ;;  %v2391_v11 = vld [vmem:[#allocation8 + $0x680] sm:$0xff]  ;;  %v2206_v53 = vld [vmem:[#allocation8 + $0x588] sm:$0xff] }
 0x459   :  { %2862 = vmatprep.subr.mxu1 %v2405_v13  ;;  %v2375_v12 = vld [vmem:[#allocation8 + $0x600] sm:$0xff]  ;;  %v2190_v13 = vld [vmem:[#allocation8 + $0x508] sm:$0xff] }
 0x45a   :  { %2863 = vmatpush3.msra.mxu1 %v2389_v14  ;;  %v3481_v21 = vadd.f32 %v2754_v3, %v1553_v15  ;;  %v2393_v3 = vld [vmem:[#allocation8 + $0x690] sm:$0xff]  ;;  %v2205_v14 = vld [vmem:[#allocation8 + $0x580] sm:$0xff] }
 0x45b   :  { %2864 = vmatprep.subr.mxu1 %v2404_v17  ;;  %v2189_v15 = vld [vmem:[#allocation8 + $0x500] sm:$0xff] }
 0x45c   :  { %v1811_v27 = vpop.f32.mrf.mxu0  ;;  %2865 = vmatpush3.msra.mxu1 %v2388_v18  ;;  %v3494_v17 = vld [vmem:[#allocation2 + $0x40] sm:$0xff] }
 0x45d   :  { %2866 = vmatprep.subr.mxu1 %v2403_v46 }
 0x45e   :  { %v1813_v30 = vpop.f32.mrf.mxu0  ;;  %2867 = vmatpush3.msra.mxu1 %v2387_v42 }
 0x45f   :  { %2639 = vmatprep.mubr.msk.f32.mxu0 %vm1290_vm12, %v1813_v30  ;;  %2868 = vmatprep.subr.mxu1 %v2402_v28 }
 0x460   :  { %1920 = vmatmul.mubr.f32.vlgmr.msra.gmra.mxu0 %v1811_v27  ;;  %2869 = vmatpush3.msra.mxu1 %v2386_v29 }
 0x461   :  { %2142 = vmatpush1.msra.mxu0 %v3392_v20  ;;  %2181 = vmatprep.mubr.f32.mxu0 %v3379_v45  ;;  %v2204_v45 = vld [vmem:[#allocation8 + $0x578] sm:$0xff] }
 0x462   :  { %2143 = vmatprep.subr.mxu0 %v3394_v22  ;;  %2870 = vmatprep.subr.mxu1 %v2401_v32  ;;  %v2398_v20 = vld [vmem:[#allocation8 + $0x6b8] sm:$0xff]  ;;  %v2219_v22 = vld [vmem:[#allocation8 + $0x5f0] sm:$0xff] }
 0x463   :  { %2144 = vmatpush1.msra.mxu0 %v3397_v50  ;;  %2871 = vmatpush3.msra.mxu1 %v2385_v33  ;;  %v2382_v50 = vld [vmem:[#allocation8 + $0x638] sm:$0xff] }
 0x464   :  { %2145 = vmatprep.subr.mxu0 %v3400_v23  ;;  %2872 = vmatprep.subr.mxu1 %v2400_v34  ;;  %v2203_v23 = vld [vmem:[#allocation8 + $0x570] sm:$0xff] }
 0x465   :  { %2146 = vmatpush1.msra.mxu0 %v3403_v24  ;;  %2873 = vmatpush3.msra.mxu1 %v2384_v36  ;;  %v2218_v24 = vld [vmem:[#allocation8 + $0x5e8] sm:$0xff] }
 0x466   :  { %2147 = vmatprep.subr.mxu0 %v3406_v25  ;;  %2874 = vmatprep.subr.mxu1 %v2399_v37  ;;  %v2217_v25 = vld [vmem:[#allocation8 + $0x5e0] sm:$0xff] }
 0x467   :  { %2148 = vmatpush1.msra.mxu0 %v3409_v26  ;;  %2875 = vmatpush3.msra.mxu1 %v2383_v38  ;;  %v2201_v26 = vld [vmem:[#allocation8 + $0x560] sm:$0xff] }
 0x468   :  { %2643 = vmatmul.mubr.msk.f32.vlgmr.msra.gmra.mxu0 %vm1183_vm11, %v2113_v39  ;;  %2825 = vmatprep.subr.msk.mxu0 %vm1018_vm10, %v2220_v35  ;;  %v2500_v38 = vld [vmem:[%s3579_s9 + $0x78] sm:$0xff]  ;;  %v2499_v39 = vld [vmem:[%s3579_s9 + $0x70] sm:$0xff]  ;;  %v2497_v35 = vld [vmem:[%s3579_s9 + $0x60] sm:$0xff] }
 0x469   :  { %2826 = vmatpush3.msra.mxu0 %v2204_v45  ;;  %2876 = vmatprep.subr.mxu1 %v2398_v20  ;;  %v2496_v45 = vld [vmem:[%s3579_s9 + $0x58] sm:$0xff]  ;;  %v2495_v20 = vld [vmem:[%s3579_s9 + $0x50] sm:$0xff] }
 0x46a   :  { %2827 = vmatprep.subr.mxu0 %v2219_v22  ;;  %2877 = vmatpush3.msra.mxu1 %v2382_v50  ;;  %v2494_v22 = vld [vmem:[%s3579_s9 + $0x48] sm:$0xff]  ;;  %v2493_v50 = vld [vmem:[%s3579_s9 + $0x40] sm:$0xff] }
 0x46b   :  { %2828 = vmatpush3.msra.mxu0 %v2203_v23  ;;  %2878 = vmatprep.subr.mxu1 %v2397_v40  ;;  %v2492_v23 = vld [vmem:[%s3579_s9 + $0x38] sm:$0xff]  ;;  %v2491_v40 = vld [vmem:[%s3579_s9 + $0x30] sm:$0xff] }
 0x46c   :  { %2829 = vmatprep.subr.mxu0 %v2218_v24  ;;  %2879 = vmatpush3.msra.mxu1 %v2381_v6  ;;  %v2490_v24 = vld [vmem:[%s3579_s9 + $0x28] sm:$0xff] }
 0x46d   :  { %2830 = vmatpush3.msra.mxu0 %v2202_v43  ;;  %2880 = vmatprep.subr.mxu1 %v2396_v16  ;;  %v2489_v43 = vld [vmem:[%s3579_s9 + $0x20] sm:$0xff] }
 0x46e   :  { %2831 = vmatprep.subr.mxu0 %v2217_v25  ;;  %2881 = vmatpush3.msra.mxu1 %v2380_v61  ;;  %v2488_v25 = vld [vmem:[%s3579_s9 + $0x18] sm:$0xff] }
 0x46f   :  { %2832 = vmatpush3.msra.mxu0 %v2201_v26  ;;  %2882 = vmatprep.subr.mxu1 %v2395_v62  ;;  %v2487_v26 = vld [vmem:[%s3579_s9 + $0x10] sm:$0xff] }
 0x470   :  { %2833 = vmatprep.subr.mxu0 %v2216_v44  ;;  %2883 = vmatpush3.msra.mxu1 %v2379_v41  ;;  %v2486_v44 = vld [vmem:[%s3579_s9 + $0x8] sm:$0xff] }
 0x471   :  { %2834 = vmatpush3.msra.mxu0 %v2200_v48  ;;  %2884 = vmatprep.subr.mxu1 %v2394_v60  ;;  %v2485_v48 = vld [vmem:[%s3579_s9] sm:$0xff] }
 0x472   :  { %2835 = vmatprep.subr.mxu0 %v2215_v47  ;;  %2885 = vmatpush3.msra.mxu1 %v2378_v1 }
 0x473   :  { %2836 = vmatpush3.msra.mxu0 %v2199_v49  ;;  %2886 = vmatprep.subr.mxu1 %v2393_v3 }
 0x474   :  { %2837 = vmatprep.subr.mxu0 %v2214_v52  ;;  %2887 = vmatpush3.msra.mxu1 %v2377_v5 }
 0x475   :  { %2838 = vmatpush3.msra.mxu0 %v2198_v0  ;;  %2888 = vmatprep.subr.mxu1 %v2392_v7 }
 0x476   :  { %2839 = vmatprep.subr.mxu0 %v2213_v54  ;;  %2889 = vmatpush3.msra.mxu1 %v2376_v9 }
 0x477   :  { %2840 = vmatpush3.msra.mxu0 %v2197_v51  ;;  %2890 = vmatprep.subr.mxu1 %v2391_v11 }
 0x478   :  { %2841 = vmatprep.subr.mxu0 %v2212_v55  ;;  %2891 = vmatpush3.msra.mxu1 %v2375_v12 }
 0x479   :  { %2842 = vmatpush3.msra.mxu0 %v2196_v56 }
 0x47a   :  { %2843 = vmatprep.subr.mxu0 %v2211_v57 }
 0x47b   :  { %2844 = vmatpush3.msra.mxu0 %v2195_v31  ;;  %v2649_v31 = vld [vmem:[%s3580_s10] ss:$0 sm:$0xff] }
 0x47c   :  { %2845 = vmatprep.subr.mxu0 %v2210_v59 }
 0x47d   :  { %2846 = vmatpush3.msra.mxu0 %v2194_v63 }
 0x47e   :  { %2847 = vmatprep.subr.mxu0 %v2209_v58 }
 0x47f   :  { %2848 = vmatpush3.msra.mxu0 %v2193_v2 }
 0x480   :  { %2849 = vmatprep.subr.mxu0 %v2208_v4 }
 0x481   :  { %2850 = vmatpush3.msra.mxu0 %v2192_v19 }
 0x482   :  { %2851 = vmatprep.subr.mxu0 %v2207_v8 }
 0x483   :  { %2852 = vmatpush3.msra.mxu0 %v2191_v10 }
 0x484   :  { %2853 = vmatprep.subr.mxu0 %v2206_v53 }
 0x485   :  { %2854 = vmatpush3.msra.mxu0 %v2190_v13 }
 0x486   :  { %2855 = vmatprep.subr.mxu0 %v2205_v14 }
 0x487   :  { %2856 = vmatpush3.msra.mxu0 %v2189_v15 }
 0x488   :  { %2912 = vmatprep.subr.mxu0 %v3494_v17 }
 0x50f   :  { %v2822_v18 = vpop.f32.mrf.mxu1 }
 0x511   :  { %v2823_v46 = vpop.f32.mrf.mxu1 }
 0x512   :  { %v2824_v42 = vadd.f32 %v2823_v46, %v2822_v18 }
 0x517   :  { %v2369_v27 = vpop.f32.mrf.mxu1 }
 0x519   :  { %v2371_v28 = vpop.f32.mrf.mxu1 }
 0x51a   :  { %2648 = vmatprep.mubr.msk.f32.mxu1 %vm1290_vm12, %v2371_v28 }
 0x51b   :  { %2478 = vmatmul.mubr.f32.vlgmr.msra.gmra.mxu1 %v2369_v27 }
 0x520   :  { %v2787_v29 = vpop.f32.mrf.mxu0 }
 0x522   :  { %v2788_v30 = vpop.f32.mrf.mxu0 }
 0x523   :  { %v2789_v32 = vadd.f32 %v2788_v30, %v2787_v29 }
 0x525   :  { %v1925_v33 = vadd.f32 %v2789_v32, %v3481_v21  ;;  %v2498_v21 = vld [vmem:[%s3579_s9 + $0x68] sm:$0xff]  ;;  %s2585_s9 = sshll.u32 %s3064_s14, 4  ;;  %s2586_s9 = int_to_ptr.vmem [resolvable:$true] %s2585_s9 }
 0x526   :  { %s3025_s15 = scalar_lea.vmem %s2586_s9, 32  ;;  %p3030_p2 = scmp.lt.s32.totalorder %s2586_s9, %s2586_s9 }
 0x527   :  { %v2111_v34 = vadd.f32 %v2824_v42, %v1925_v33  ;;  %p3026_p1 = scmp.ne.s32.totalorder %s2586_s9, %s3025_s15  ;;  %p3031_p3 = scmp.lt.s32.totalorder %s3025_s15, %s3025_s15 }
 0x528   :  { %v2183_v36 = vpop.f32.mrf.mxu0 }
 0x529   :  { %p3032_p4 = por %p3031_p3, %p3030_p2 }
 0x52a   :  { %v2185_v37 = vpop.f32.mrf.mxu0 }
 0x52b   :  { %2645 = vmatprep.mubr.msk.f32.mxu0 %vm1290_vm12, %v2185_v37  ;;  %p3033_p5 = pnand %p3032_p4, %p3026_p1 }
 0x52c   :  { %2292 = vmatmul.mubr.f32.vlgmr.msra.gmra.mxu0 %v2183_v36 }
 0x52d   :  { %2913 = vmatpush3.msra.mxu0 %v2500_v38  ;;  %2944 = vmatprep.mubr.msk.f32.mxu0 %vm3063_vm13, %v3494_v17 }
 0x52e   :  { %2914 = vmatprep.subr.mxu0 %v3494_v17 }
 0x52f   :  { %2915 = vmatpush3.msra.mxu0 %v2499_v39 }
 0x530   :  { %2916 = vmatprep.subr.mxu0 %v3494_v17 }
 0x531   :  { %2917 = vmatpush3.msra.mxu0 %v2498_v21 }
 0x532   :  { %2918 = vmatprep.subr.mxu0 %v3494_v17 }
 0x533   :  { %2919 = vmatpush3.msra.mxu0 %v2497_v35 }
 0x534   :  { %2920 = vmatprep.subr.mxu0 %v3494_v17 }
 0x535   :  { %2921 = vmatpush3.msra.mxu0 %v2496_v45 }
 0x536   :  { %2922 = vmatprep.subr.mxu0 %v3494_v17 }
 0x537   :  { %2923 = vmatpush3.msra.mxu0 %v2495_v20 }
 0x538   :  { %2924 = vmatprep.subr.mxu0 %v3494_v17 }
 0x539   :  { %2925 = vmatpush3.msra.mxu0 %v2494_v22 }
 0x53a   :  { %2926 = vmatprep.subr.mxu0 %v3494_v17 }
 0x53b   :  { %2927 = vmatpush3.msra.mxu0 %v2493_v50 }
 0x53c   :  { %2928 = vmatprep.subr.mxu0 %v3494_v17 }
 0x53d   :  { %2929 = vmatpush3.msra.mxu0 %v2492_v23 }
 0x53e   :  { %2930 = vmatprep.subr.mxu0 %v3494_v17 }
 0x53f   :  { %2931 = vmatpush3.msra.mxu0 %v2491_v40 }
 0x540   :  { %2932 = vmatprep.subr.mxu0 %v3494_v17 }
 0x541   :  { %2933 = vmatpush3.msra.mxu0 %v2490_v24 }
 0x542   :  { %2934 = vmatprep.subr.mxu0 %v3494_v17 }
 0x543   :  { %2935 = vmatpush3.msra.mxu0 %v2489_v43 }
 0x544   :  { %2936 = vmatprep.subr.mxu0 %v3494_v17 }
 0x545   :  { %2937 = vmatpush3.msra.mxu0 %v2488_v25 }
 0x546   :  { %2938 = vmatprep.subr.mxu0 %v3494_v17 }
 0x547   :  { %2939 = vmatpush3.msra.mxu0 %v2487_v26 }
 0x548   :  { %2940 = vmatprep.subr.mxu0 %v3494_v17 }
 0x549   :  { %2941 = vmatpush3.msra.mxu0 %v2486_v44 }
 0x54a   :  { %2942 = vmatprep.subr.mxu0 %v3494_v17 }
 0x54b   :  { %2943 = vmatpush3.msra.mxu0 %v2485_v48 }
 0x5db   :  { %v2892_v47 = vpop.f32.mrf.mxu1 }
 0x5dd   :  { %v2893_v0 = vpop.f32.mrf.mxu1 }
 0x5de   :  { %v2894_v55 = vadd.f32 %v2893_v0, %v2892_v47 }
 0x5ec   :  { %v2857_v49 = vpop.f32.mrf.mxu0 }
 0x5ee   :  { %v2858_v52 = vpop.f32.mrf.mxu0 }
 0x5ef   :  { %v2859_v54 = vadd.f32 %v2858_v52, %v2857_v49 }
 0x5f1   :  { %v2297_v51 = vadd.f32 %v2859_v54, %v2111_v34 }
 0x5f3   :  { %v2483_v56 = vadd.f32 %v2894_v55, %v2297_v51 }
 0x5f5   :  { %v2484_v57 = vmax.f32 %v2483_v56, 0.0 }
 0x5f7   :  { %2945 = vmatmul.mubr.f32.vlgmr.msra.gmra.mxu0 %v2484_v57 }
 0x6b7   :  { %v2574_v59 = vpop.f32.mrf.mxu0 }
 0x6b8   :  { %v2575_v6 = vadd.f32 %v2649_v31, %v2574_v59 }
 0x6b9   :  { %v2946_v16 = vpop.f32.mrf.mxu0 }
 0x6ba   :  { %2578 = vst [vmem:[#allocation9] sm:$0x3] %v2575_v6 }
 0x6bb   :  { %3036 = shalt.err (!%p3033_p5)
}
 0x6bc   :  { %2588 = dma.vmem_to_hbm [thread:$0]  %s2586_s9, 32, %s3581_s11, [#allocation5]  }
 0x6bd   :  { %3049 = dma.done.wait [#allocation5], 32  }
 0x6be   :  { %3050 = vsyncadd [#allocation5], 4294967264 }
 0x6bf   :  { %2592 = vsyncpa [#allocation4], 1 }
 0x6c0   :  { %2593 = vsyncpa [#allocation7], 1 }
 0x6c1   :  { %2594 = vsyncpa [#allocation5], 1 }

</bundles_post_ra>
